<compile_context>
chip_gen: v7x
topology: tpu7x:2x2x1
jax: 0.10.0
libtpu: 0.0.40
codegen_flags: <defaults>
</compile_context>

<pallas_src>
import math
import functools

import jax
import jax.numpy as jnp
from jax.experimental import pallas as pl
from jax.experimental.pallas import tpu as pltpu

LN_EPS = 1e-5  # nn.LayerNorm default


def _layer_norm(y, w, b):
    # two-pass mean/var (more accurate than E[x^2]-mu^2), var clamped >= 0
    inv_n = 1.0 / y.shape[-1]
    mu = jnp.sum(y, axis=-1, keepdims=True) * inv_n
    d = y - mu
    var = jnp.maximum(jnp.sum(d * d, axis=-1, keepdims=True) * inv_n, 0.0)
    return d * jax.lax.rsqrt(var + LN_EPS) * w + b


# --------------------------- fused encoder kernel --------------------------- #
def _encoder_kernel(B, S, E, H,
                    x_ref, embw_ref, embb_ref,
                    wqkv_ref, bqkv_ref, wo_ref, bo_ref,
                    ln1w_ref, ln1b_ref,
                    w1_ref, b1_ref, w2_ref, b2_ref,
                    ln2w_ref, ln2b_ref,
                    out_ref):
    l = pl.program_id(0)
    N = B * S
    Dh = E // H

    # Layer 0: fused embedding projection seeds the VMEM-resident residual
    # stream (the output block index is constant over the layer axis, so the
    # activations never round-trip to HBM between layers).
    @pl.when(l == 0)
    def _():
        out_ref[...] = (
            jnp.dot(x_ref[...].astype(jnp.bfloat16), embw_ref[...],
                    preferred_element_type=jnp.float32) + embb_ref[...]
        )

    x = out_ref[...]                               # (N, E) f32 residual stream
    x_bf = x.astype(jnp.bfloat16)

    # --- fused QKV projection (1/sqrt(Dh) pre-folded into the q columns) ---
    qkv = jnp.dot(x_bf, wqkv_ref[...],
                  preferred_element_type=jnp.float32) + bqkv_ref[...]    # (N, 3E)
    qkv = qkv.reshape(B, S, 3 * E)

    # --- attention, batched over B; heads statically unrolled ---
    heads = []
    for h in range(H):
        lo = h * Dh
        qh = qkv[..., lo:lo + Dh].astype(jnp.bfloat16)                   # (B,S,Dh)
        kh = qkv[..., E + lo:E + lo + Dh].astype(jnp.bfloat16)
        vh = qkv[..., 2 * E + lo:2 * E + lo + Dh].astype(jnp.bfloat16)
        s = jnp.einsum('bqd,bkd->bqk', qh, kh,
                       preferred_element_type=jnp.float32)               # (B,S,S)
        s = s - jnp.max(s, axis=-1, keepdims=True)
        p = jnp.exp(s)
        p = p / jnp.sum(p, axis=-1, keepdims=True)                       # exact
        heads.append(jnp.einsum('bqk,bkd->bqd', p.astype(jnp.bfloat16), vh,
                                preferred_element_type=jnp.float32))     # (B,S,Dh)
    attn = jnp.concatenate(heads, axis=-1).reshape(N, E)
    attn = jnp.dot(attn.astype(jnp.bfloat16), wo_ref[...],
                   preferred_element_type=jnp.float32) + bo_ref[...]

    # --- residual + LayerNorm 1 (post-norm; dropout = identity) ---
    y = _layer_norm(x + attn, ln1w_ref[...], ln1b_ref[...])

    # --- feed-forward (ReLU) ---
    hdn = jnp.dot(y.astype(jnp.bfloat16), w1_ref[...],
                  preferred_element_type=jnp.float32) + b1_ref[...]
    hdn = jnp.maximum(hdn, 0.0)
    ffn = jnp.dot(hdn.astype(jnp.bfloat16), w2_ref[...],
                  preferred_element_type=jnp.float32) + b2_ref[...]

    # --- residual + LayerNorm 2 ---
    out_ref[...] = _layer_norm(y + ffn, ln2w_ref[...], ln2b_ref[...]).astype(
        out_ref.dtype)


def encoder_forward(xf, params, B, S, num_heads):
    # xf: (B*S, Din) f32
    N, Din = xf.shape
    sp = params["stack"]
    E = params["emb_w_t"].shape[1]
    L = sp["wqkv"].shape[0]
    F = sp["w1"].shape[-1]

    kernel = functools.partial(_encoder_kernel, B, S, E, num_heads)

    def full(shape):      # whole-array block, constant block index (no re-DMA)
        return pl.BlockSpec(shape, lambda l, _z=(0,) * len(shape): _z)

    def per_layer(shape):  # per-layer weight slab, auto-pipelined over l
        return pl.BlockSpec((None,) + shape,
                            lambda l, _z=(0,) * len(shape): (l,) + _z)

    return pl.pallas_call(
        kernel,
        out_shape=jax.ShapeDtypeStruct((N, E), jnp.float32),
        grid=(L,),                      # layers sequential; batch folded into block
        in_specs=[
            full((N, Din)),             # x (only read at l == 0)
            full((Din, E)),             # emb_w_t
            full((1, E)),               # emb_b
            per_layer((E, 3 * E)),      # wqkv
            per_layer((1, 3 * E)),      # bqkv
            per_layer((E, E)),          # wo
            per_layer((1, E)),          # bo
            per_layer((1, E)),          # ln1_w
            per_layer((1, E)),          # ln1_b
            per_layer((E, F)),          # w1
            per_layer((1, F)),          # b1
            per_layer((F, E)),          # w2
            per_layer((1, E)),          # b2
            per_layer((1, E)),          # ln2_w
            per_layer((1, E)),          # ln2_b
        ],
        out_specs=full((N, E)),         # constant block -> resident across layers
        compiler_params=pltpu.CompilerParams(
            dimension_semantics=("arbitrary",),
            vmem_limit_bytes=32 * 1024 * 1024),
    )(xf, params["emb_w_t"], params["emb_b"],
      sp["wqkv"], sp["bqkv"], sp["wo"], sp["bo"],
      sp["ln1_w"], sp["ln1_b"], sp["w1"], sp["b1"], sp["w2"], sp["b2"],
      sp["ln2_w"], sp["ln2_b"])


# ------------------------------ parameter init ------------------------------ #
def init_params(key, input_dim, embed_dim, num_heads, num_layers,
                dim_feedforward=2048):
    E, F, L = embed_dim, dim_feedforward, num_layers
    Dh = E // num_heads
    scale = 1.0 / math.sqrt(Dh)
    keys = jax.random.split(key, 8)

    def normal(k, shape, std=0.02):
        return (std * jax.random.normal(k, shape)).astype(jnp.float32)

    # fold 1/sqrt(Dh) into the q projection (host-side, free at runtime)
    wqkv = normal(keys[2], (L, E, 3 * E))
    wqkv = wqkv.at[:, :, :E].multiply(scale)
    bqkv = jnp.zeros((L, 1, 3 * E), jnp.float32)   # zeros -> scale fold is a no-op

    return {
        # matmul weights stored pre-transposed (in, out) and in bf16
        "emb_w_t": normal(keys[0], (input_dim, E)).astype(jnp.bfloat16),
        "emb_b": normal(keys[1], (1, E)),
        "stack": {
            "wqkv": wqkv.astype(jnp.bfloat16),
            "bqkv": bqkv,
            "wo": normal(keys[3], (L, E, E)).astype(jnp.bfloat16),
            "bo": jnp.zeros((L, 1, E), jnp.float32),
            "ln1_w": jnp.ones((L, 1, E), jnp.float32),
            "ln1_b": jnp.zeros((L, 1, E), jnp.float32),
            "w1": normal(keys[4], (L, E, F)).astype(jnp.bfloat16),
            "b1": normal(keys[5], (L, 1, F)),
            "w2": normal(keys[6], (L, F, E)).astype(jnp.bfloat16),
            "b2": normal(keys[7], (L, 1, E)),
            "ln2_w": jnp.ones((L, 1, E), jnp.float32),
            "ln2_b": jnp.zeros((L, 1, E), jnp.float32),
        },
    }


# --------------------------------- forward ---------------------------------- #
def transformer_encoder_forward(x, params, num_heads):
    # x: (S, B, input_dim) -- same convention as the PyTorch module (batch_first=False)
    S, B, Din = x.shape
    E = params["emb_w_t"].shape[1]
    xf = jnp.transpose(x, (1, 0, 2)).reshape(B * S, Din)   # host-side glue only
    h = encoder_forward(xf, params, B, S, num_heads)        # one fused Pallas call
    return jnp.transpose(h.reshape(B, S, E), (1, 0, 2))     # back to (S, B, E)


if __name__ == "__main__":
    INPUT_DIM = 16
    EMBED_DIM = 32
    NUM_HEADS = 4
    NUM_LAYERS = 2
    SEQ = 8
    BATCH = 2

    key = jax.random.PRNGKey(0)
    k_params, k_x = jax.random.split(key)
    params = init_params(k_params, INPUT_DIM, EMBED_DIM, NUM_HEADS, NUM_LAYERS)
    x = jax.random.normal(k_x, (SEQ, BATCH, INPUT_DIM), dtype=jnp.float32)

    fwd = jax.jit(functools.partial(transformer_encoder_forward,
                                    num_heads=NUM_HEADS))
    out = fwd(x, params)
    jax.block_until_ready(out)
    assert out.shape == (SEQ, BATCH, EMBED_DIM)
    assert bool(jnp.all(jnp.isfinite(out)))
    print("KERNEL_OK")
</pallas_src>

<mosaic_0001>
module attributes {stable_mosaic.version = 11 : i64} {
  func.func @_encoder_kernel(%arg0: i32, %arg1: memref<16x16xf32, #tpu.memory_space<vmem>>, %arg2: memref<16x32xbf16, #tpu.memory_space<vmem>>, %arg3: memref<1x32xf32, #tpu.memory_space<vmem>>, %arg4: memref<1x32x96xbf16, #tpu.memory_space<vmem>>, %arg5: memref<1x1x96xf32, #tpu.memory_space<vmem>>, %arg6: memref<1x32x32xbf16, #tpu.memory_space<vmem>>, %arg7: memref<1x1x32xf32, #tpu.memory_space<vmem>>, %arg8: memref<1x1x32xf32, #tpu.memory_space<vmem>>, %arg9: memref<1x1x32xf32, #tpu.memory_space<vmem>>, %arg10: memref<1x32x2048xbf16, #tpu.memory_space<vmem>>, %arg11: memref<1x1x2048xf32, #tpu.memory_space<vmem>>, %arg12: memref<1x2048x32xbf16, #tpu.memory_space<vmem>>, %arg13: memref<1x1x32xf32, #tpu.memory_space<vmem>>, %arg14: memref<1x1x32xf32, #tpu.memory_space<vmem>>, %arg15: memref<1x1x32xf32, #tpu.memory_space<vmem>>, %arg16: memref<16x32xf32, #tpu.memory_space<vmem>>) attributes {dimension_semantics = [#tpu.dimension_semantics<arbitrary>], iteration_bounds = array<i64: 2>, scalar_prefetch = 0 : i64, scratch_operands = 0 : i64, tpu.core_type = #tpu.core_type<tc>, window_params = [{pipeline_mode = #tpu.pipeline_mode<synchronous>, transform_indices = @transform_0, window_bounds = array<i64: 16, 16>}, {pipeline_mode = #tpu.pipeline_mode<synchronous>, transform_indices = @transform_1, window_bounds = array<i64: 16, 32>}, {pipeline_mode = #tpu.pipeline_mode<synchronous>, transform_indices = @transform_2, window_bounds = array<i64: 1, 32>}, {transform_indices = @transform_3, window_bounds = array<i64: 1, 32, 96>}, {transform_indices = @transform_4, window_bounds = array<i64: 1, 1, 96>}, {transform_indices = @transform_5, window_bounds = array<i64: 1, 32, 32>}, {transform_indices = @transform_6, window_bounds = array<i64: 1, 1, 32>}, {transform_indices = @transform_7, window_bounds = array<i64: 1, 1, 32>}, {transform_indices = @transform_8, window_bounds = array<i64: 1, 1, 32>}, {transform_indices = @transform_9, window_bounds = array<i64: 1, 32, 2048>}, {transform_indices = @transform_10, window_bounds = array<i64: 1, 1, 2048>}, {transform_indices = @transform_11, window_bounds = array<i64: 1, 2048, 32>}, {transform_indices = @transform_12, window_bounds = array<i64: 1, 1, 32>}, {transform_indices = @transform_13, window_bounds = array<i64: 1, 1, 32>}, {transform_indices = @transform_14, window_bounds = array<i64: 1, 1, 32>}, {pipeline_mode = #tpu.pipeline_mode<synchronous>, transform_indices = @transform_15, window_bounds = array<i64: 16, 32>}]} {
    %c0_i32 = arith.constant 0 : i32
    %0 = arith.cmpi eq, %arg0, %c0_i32 : i32
    %1 = arith.extui %0 : i1 to i32
    %c0_i32_0 = arith.constant 0 : i32
    %2 = arith.cmpi ne, %1, %c0_i32_0 : i32
    scf.if %2 {
      %c0_72 = arith.constant 0 : index
      %c0_73 = arith.constant 0 : index
      %168 = vector.load %arg1[%c0_72, %c0_73] : memref<16x16xf32, #tpu.memory_space<vmem>>, vector<16x16xf32>
      %169 = arith.truncf %168 : vector<16x16xf32> to vector<16x16xbf16>
      %c0_74 = arith.constant 0 : index
      %c0_75 = arith.constant 0 : index
      %170 = vector.load %arg2[%c0_74, %c0_75] : memref<16x32xbf16, #tpu.memory_space<vmem>>, vector<16x32xbf16>
      %cst_76 = arith.constant dense<0.000000e+00> : vector<16x32xf32>
      %171 = tpu.matmul %169, %170, %cst_76 {dimension_numbers = #tpu.dot_dimension_numbers<[1], [0], [0], [1], [0, 0, 1, 1], [], []>} : vector<16x16xbf16>, vector<16x32xbf16>, vector<16x32xf32> -> vector<16x32xf32>
      %c0_77 = arith.constant 0 : index
      %c0_78 = arith.constant 0 : index
      %172 = vector.load %arg3[%c0_77, %c0_78] : memref<1x32xf32, #tpu.memory_space<vmem>>, vector<1x32xf32>
      %173 = vector.broadcast %172 : vector<1x32xf32> to vector<16x32xf32>
      %174 = arith.addf %171, %173 : vector<16x32xf32>
      %c0_79 = arith.constant 0 : index
      %c0_80 = arith.constant 0 : index
      %175 = vector.load %arg16[%c0_79, %c0_80] : memref<16x32xf32, #tpu.memory_space<vmem>>, vector<16x32xf32>
      tpu.vector_store %arg16[%c0_79, %c0_80], %174 {strides = array<i32>} : memref<16x32xf32, #tpu.memory_space<vmem>>, vector<16x32xf32>,
    } else {
    }
    %c0 = arith.constant 0 : index
    %c0_1 = arith.constant 0 : index
    %3 = vector.load %arg16[%c0, %c0_1] : memref<16x32xf32, #tpu.memory_space<vmem>>, vector<16x32xf32>
    %4 = arith.truncf %3 : vector<16x32xf32> to vector<16x32xbf16>
    %c0_2 = arith.constant 0 : index
    %c0_3 = arith.constant 0 : index
    %c0_4 = arith.constant 0 : index
    %5 = vector.load %arg4[%c0_2, %c0_3, %c0_4] : memref<1x32x96xbf16, #tpu.memory_space<vmem>>, vector<1x32x96xbf16>
    %6 = vector.shape_cast %5 : vector<1x32x96xbf16> to vector<32x96xbf16>
    %cst = arith.constant dense<0.000000e+00> : vector<16x96xf32>
    %7 = tpu.matmul %4, %6, %cst {dimension_numbers = #tpu.dot_dimension_numbers<[1], [0], [0], [1], [0, 0, 1, 1], [], []>} : vector<16x32xbf16>, vector<32x96xbf16>, vector<16x96xf32> -> vector<16x96xf32>
    %c0_5 = arith.constant 0 : index
    %c0_6 = arith.constant 0 : index
    %c0_7 = arith.constant 0 : index
    %8 = vector.load %arg5[%c0_5, %c0_6, %c0_7] : memref<1x1x96xf32, #tpu.memory_space<vmem>>, vector<1x1x96xf32>
    %9 = vector.shape_cast %8 : vector<1x1x96xf32> to vector<1x96xf32>
    %10 = vector.broadcast %9 : vector<1x96xf32> to vector<16x96xf32>
    %11 = arith.addf %7, %10 : vector<16x96xf32>
    %12 = vector.shape_cast %11 : vector<16x96xf32> to vector<2x8x96xf32>
    %13 = vector.extract_strided_slice %12 {offsets = [0, 0, 0], sizes = [2, 8, 8], strides = [1, 1, 1]} : vector<2x8x96xf32> to vector<2x8x8xf32>
    %14 = arith.truncf %13 : vector<2x8x8xf32> to vector<2x8x8xbf16>
    %15 = vector.extract_strided_slice %12 {offsets = [0, 0, 32], sizes = [2, 8, 8], strides = [1, 1, 1]} : vector<2x8x96xf32> to vector<2x8x8xf32>
    %16 = arith.truncf %15 : vector<2x8x8xf32> to vector<2x8x8xbf16>
    %17 = vector.extract_strided_slice %12 {offsets = [0, 0, 64], sizes = [2, 8, 8], strides = [1, 1, 1]} : vector<2x8x96xf32> to vector<2x8x8xf32>
    %18 = arith.truncf %17 : vector<2x8x8xf32> to vector<2x8x8xbf16>
    "tpu.trace_start"() <{level = 10 : i32, message = "bqd,bkd->bqk"}> : () -> ()
    %cst_8 = arith.constant dense<0.000000e+00> : vector<2x8x8xf32>
    %19 = tpu.matmul %14, %16, %cst_8 {dimension_numbers = #tpu.dot_dimension_numbers<[2], [2], [1], [1], [0, 0, 0, 1, 1, 1], [0], [0]>} : vector<2x8x8xbf16>, vector<2x8x8xbf16>, vector<2x8x8xf32> -> vector<2x8x8xf32>
    "tpu.trace_stop"() : () -> ()
    %cst_9 = arith.constant dense<0xFF800000> : vector<2x8xf32>
    %20 = vector.multi_reduction <maximumf>, %19, %cst_9 [2] : vector<2x8x8xf32> to vector<2x8xf32>
    %21 = vector.shape_cast %20 : vector<2x8xf32> to vector<2x8x1xf32>
    %22 = vector.broadcast %21 : vector<2x8x1xf32> to vector<2x8x8xf32>
    %23 = arith.subf %19, %22 : vector<2x8x8xf32>
    %24 = math.exp %23 : vector<2x8x8xf32>
    %cst_10 = arith.constant dense<0.000000e+00> : vector<2x8xf32>
    %25 = vector.multi_reduction <add>, %24, %cst_10 [2] : vector<2x8x8xf32> to vector<2x8xf32>
    %26 = vector.shape_cast %25 : vector<2x8xf32> to vector<2x8x1xf32>
    %27 = vector.broadcast %26 : vector<2x8x1xf32> to vector<2x8x8xf32>
    %28 = arith.divf %24, %27 : vector<2x8x8xf32>
    %29 = arith.truncf %28 : vector<2x8x8xf32> to vector<2x8x8xbf16>
    "tpu.trace_start"() <{level = 10 : i32, message = "bqk,bkd->bqd"}> : () -> ()
    %cst_11 = arith.constant dense<0.000000e+00> : vector<2x8x8xf32>
    %30 = tpu.matmul %29, %18, %cst_11 {dimension_numbers = #tpu.dot_dimension_numbers<[2], [1], [1], [2], [0, 0, 0, 1, 1, 2], [0], [0]>} : vector<2x8x8xbf16>, vector<2x8x8xbf16>, vector<2x8x8xf32> -> vector<2x8x8xf32>
    "tpu.trace_stop"() : () -> ()
    %31 = vector.extract_strided_slice %12 {offsets = [0, 0, 8], sizes = [2, 8, 8], strides = [1, 1, 1]} : vector<2x8x96xf32> to vector<2x8x8xf32>
    %32 = arith.truncf %31 : vector<2x8x8xf32> to vector<2x8x8xbf16>
    %33 = vector.extract_strided_slice %12 {offsets = [0, 0, 40], sizes = [2, 8, 8], strides = [1, 1, 1]} : vector<2x8x96xf32> to vector<2x8x8xf32>
    %34 = arith.truncf %33 : vector<2x8x8xf32> to vector<2x8x8xbf16>
    %35 = vector.extract_strided_slice %12 {offsets = [0, 0, 72], sizes = [2, 8, 8], strides = [1, 1, 1]} : vector<2x8x96xf32> to vector<2x8x8xf32>
    %36 = arith.truncf %35 : vector<2x8x8xf32> to vector<2x8x8xbf16>
    "tpu.trace_start"() <{level = 10 : i32, message = "bqd,bkd->bqk"}> : () -> ()
    %cst_12 = arith.constant dense<0.000000e+00> : vector<2x8x8xf32>
    %37 = tpu.matmul %32, %34, %cst_12 {dimension_numbers = #tpu.dot_dimension_numbers<[2], [2], [1], [1], [0, 0, 0, 1, 1, 1], [0], [0]>} : vector<2x8x8xbf16>, vector<2x8x8xbf16>, vector<2x8x8xf32> -> vector<2x8x8xf32>
    "tpu.trace_stop"() : () -> ()
    %cst_13 = arith.constant dense<0xFF800000> : vector<2x8xf32>
    %38 = vector.multi_reduction <maximumf>, %37, %cst_13 [2] : vector<2x8x8xf32> to vector<2x8xf32>
    %39 = vector.shape_cast %38 : vector<2x8xf32> to vector<2x8x1xf32>
    %40 = vector.broadcast %39 : vector<2x8x1xf32> to vector<2x8x8xf32>
    %41 = arith.subf %37, %40 : vector<2x8x8xf32>
    %42 = math.exp %41 : vector<2x8x8xf32>
    %cst_14 = arith.constant dense<0.000000e+00> : vector<2x8xf32>
    %43 = vector.multi_reduction <add>, %42, %cst_14 [2] : vector<2x8x8xf32> to vector<2x8xf32>
    %44 = vector.shape_cast %43 : vector<2x8xf32> to vector<2x8x1xf32>
    %45 = vector.broadcast %44 : vector<2x8x1xf32> to vector<2x8x8xf32>
    %46 = arith.divf %42, %45 : vector<2x8x8xf32>
    %47 = arith.truncf %46 : vector<2x8x8xf32> to vector<2x8x8xbf16>
    "tpu.trace_start"() <{level = 10 : i32, message = "bqk,bkd->bqd"}> : () -> ()
    %cst_15 = arith.constant dense<0.000000e+00> : vector<2x8x8xf32>
    %48 = tpu.matmul %47, %36, %cst_15 {dimension_numbers = #tpu.dot_dimension_numbers<[2], [1], [1], [2], [0, 0, 0, 1, 1, 2], [0], [0]>} : vector<2x8x8xbf16>, vector<2x8x8xbf16>, vector<2x8x8xf32> -> vector<2x8x8xf32>
    "tpu.trace_stop"() : () -> ()
    %49 = vector.extract_strided_slice %12 {offsets = [0, 0, 16], sizes = [2, 8, 8], strides = [1, 1, 1]} : vector<2x8x96xf32> to vector<2x8x8xf32>
    %50 = arith.truncf %49 : vector<2x8x8xf32> to vector<2x8x8xbf16>
    %51 = vector.extract_strided_slice %12 {offsets = [0, 0, 48], sizes = [2, 8, 8], strides = [1, 1, 1]} : vector<2x8x96xf32> to vector<2x8x8xf32>
    %52 = arith.truncf %51 : vector<2x8x8xf32> to vector<2x8x8xbf16>
    %53 = vector.extract_strided_slice %12 {offsets = [0, 0, 80], sizes = [2, 8, 8], strides = [1, 1, 1]} : vector<2x8x96xf32> to vector<2x8x8xf32>
    %54 = arith.truncf %53 : vector<2x8x8xf32> to vector<2x8x8xbf16>
    "tpu.trace_start"() <{level = 10 : i32, message = "bqd,bkd->bqk"}> : () -> ()
    %cst_16 = arith.constant dense<0.000000e+00> : vector<2x8x8xf32>
    %55 = tpu.matmul %50, %52, %cst_16 {dimension_numbers = #tpu.dot_dimension_numbers<[2], [2], [1], [1], [0, 0, 0, 1, 1, 1], [0], [0]>} : vector<2x8x8xbf16>, vector<2x8x8xbf16>, vector<2x8x8xf32> -> vector<2x8x8xf32>
    "tpu.trace_stop"() : () -> ()
    %cst_17 = arith.constant dense<0xFF800000> : vector<2x8xf32>
    %56 = vector.multi_reduction <maximumf>, %55, %cst_17 [2] : vector<2x8x8xf32> to vector<2x8xf32>
    %57 = vector.shape_cast %56 : vector<2x8xf32> to vector<2x8x1xf32>
    %58 = vector.broadcast %57 : vector<2x8x1xf32> to vector<2x8x8xf32>
    %59 = arith.subf %55, %58 : vector<2x8x8xf32>
    %60 = math.exp %59 : vector<2x8x8xf32>
    %cst_18 = arith.constant dense<0.000000e+00> : vector<2x8xf32>
    %61 = vector.multi_reduction <add>, %60, %cst_18 [2] : vector<2x8x8xf32> to vector<2x8xf32>
    %62 = vector.shape_cast %61 : vector<2x8xf32> to vector<2x8x1xf32>
    %63 = vector.broadcast %62 : vector<2x8x1xf32> to vector<2x8x8xf32>
    %64 = arith.divf %60, %63 : vector<2x8x8xf32>
    %65 = arith.truncf %64 : vector<2x8x8xf32> to vector<2x8x8xbf16>
    "tpu.trace_start"() <{level = 10 : i32, message = "bqk,bkd->bqd"}> : () -> ()
    %cst_19 = arith.constant dense<0.000000e+00> : vector<2x8x8xf32>
    %66 = tpu.matmul %65, %54, %cst_19 {dimension_numbers = #tpu.dot_dimension_numbers<[2], [1], [1], [2], [0, 0, 0, 1, 1, 2], [0], [0]>} : vector<2x8x8xbf16>, vector<2x8x8xbf16>, vector<2x8x8xf32> -> vector<2x8x8xf32>
    "tpu.trace_stop"() : () -> ()
    %67 = vector.extract_strided_slice %12 {offsets = [0, 0, 24], sizes = [2, 8, 8], strides = [1, 1, 1]} : vector<2x8x96xf32> to vector<2x8x8xf32>
    %68 = arith.truncf %67 : vector<2x8x8xf32> to vector<2x8x8xbf16>
    %69 = vector.extract_strided_slice %12 {offsets = [0, 0, 56], sizes = [2, 8, 8], strides = [1, 1, 1]} : vector<2x8x96xf32> to vector<2x8x8xf32>
    %70 = arith.truncf %69 : vector<2x8x8xf32> to vector<2x8x8xbf16>
    %71 = vector.extract_strided_slice %12 {offsets = [0, 0, 88], sizes = [2, 8, 8], strides = [1, 1, 1]} : vector<2x8x96xf32> to vector<2x8x8xf32>
    %72 = arith.truncf %71 : vector<2x8x8xf32> to vector<2x8x8xbf16>
    "tpu.trace_start"() <{level = 10 : i32, message = "bqd,bkd->bqk"}> : () -> ()
    %cst_20 = arith.constant dense<0.000000e+00> : vector<2x8x8xf32>
    %73 = tpu.matmul %68, %70, %cst_20 {dimension_numbers = #tpu.dot_dimension_numbers<[2], [2], [1], [1], [0, 0, 0, 1, 1, 1], [0], [0]>} : vector<2x8x8xbf16>, vector<2x8x8xbf16>, vector<2x8x8xf32> -> vector<2x8x8xf32>
    "tpu.trace_stop"() : () -> ()
    %cst_21 = arith.constant dense<0xFF800000> : vector<2x8xf32>
    %74 = vector.multi_reduction <maximumf>, %73, %cst_21 [2] : vector<2x8x8xf32> to vector<2x8xf32>
    %75 = vector.shape_cast %74 : vector<2x8xf32> to vector<2x8x1xf32>
    %76 = vector.broadcast %75 : vector<2x8x1xf32> to vector<2x8x8xf32>
    %77 = arith.subf %73, %76 : vector<2x8x8xf32>
    %78 = math.exp %77 : vector<2x8x8xf32>
    %cst_22 = arith.constant dense<0.000000e+00> : vector<2x8xf32>
    %79 = vector.multi_reduction <add>, %78, %cst_22 [2] : vector<2x8x8xf32> to vector<2x8xf32>
    %80 = vector.shape_cast %79 : vector<2x8xf32> to vector<2x8x1xf32>
    %81 = vector.broadcast %80 : vector<2x8x1xf32> to vector<2x8x8xf32>
    %82 = arith.divf %78, %81 : vector<2x8x8xf32>
    %83 = arith.truncf %82 : vector<2x8x8xf32> to vector<2x8x8xbf16>
    "tpu.trace_start"() <{level = 10 : i32, message = "bqk,bkd->bqd"}> : () -> ()
    %cst_23 = arith.constant dense<0.000000e+00> : vector<2x8x8xf32>
    %84 = tpu.matmul %83, %72, %cst_23 {dimension_numbers = #tpu.dot_dimension_numbers<[2], [1], [1], [2], [0, 0, 0, 1, 1, 2], [0], [0]>} : vector<2x8x8xbf16>, vector<2x8x8xbf16>, vector<2x8x8xf32> -> vector<2x8x8xf32>
    "tpu.trace_stop"() : () -> ()
    %85 = tpu.concatenate %30, %48, %66, %84 in 2 : vector<2x8x8xf32>, vector<2x8x8xf32>, vector<2x8x8xf32>, vector<2x8x8xf32> -> vector<2x8x32xf32>
    %86 = vector.shape_cast %85 : vector<2x8x32xf32> to vector<16x32xf32>
    %87 = arith.truncf %86 : vector<16x32xf32> to vector<16x32xbf16>
    %c0_24 = arith.constant 0 : index
    %c0_25 = arith.constant 0 : index
    %c0_26 = arith.constant 0 : index
    %88 = vector.load %arg6[%c0_24, %c0_25, %c0_26] : memref<1x32x32xbf16, #tpu.memory_space<vmem>>, vector<1x32x32xbf16>
    %89 = vector.shape_cast %88 : vector<1x32x32xbf16> to vector<32x32xbf16>
    %cst_27 = arith.constant dense<0.000000e+00> : vector<16x32xf32>
    %90 = tpu.matmul %87, %89, %cst_27 {dimension_numbers = #tpu.dot_dimension_numbers<[1], [0], [0], [1], [0, 0, 1, 1], [], []>} : vector<16x32xbf16>, vector<32x32xbf16>, vector<16x32xf32> -> vector<16x32xf32>
    %c0_28 = arith.constant 0 : index
    %c0_29 = arith.constant 0 : index
    %c0_30 = arith.constant 0 : index
    %91 = vector.load %arg7[%c0_28, %c0_29, %c0_30] : memref<1x1x32xf32, #tpu.memory_space<vmem>>, vector<1x1x32xf32>
    %92 = vector.shape_cast %91 : vector<1x1x32xf32> to vector<1x32xf32>
    %93 = vector.broadcast %92 : vector<1x32xf32> to vector<16x32xf32>
    %94 = arith.addf %90, %93 : vector<16x32xf32>
    %95 = arith.addf %3, %94 : vector<16x32xf32>
    %c0_31 = arith.constant 0 : index
    %c0_32 = arith.constant 0 : index
    %c0_33 = arith.constant 0 : index
    %96 = vector.load %arg8[%c0_31, %c0_32, %c0_33] : memref<1x1x32xf32, #tpu.memory_space<vmem>>, vector<1x1x32xf32>
    %97 = vector.shape_cast %96 : vector<1x1x32xf32> to vector<1x32xf32>
    %c0_34 = arith.constant 0 : index
    %c0_35 = arith.constant 0 : index
    %c0_36 = arith.constant 0 : index
    %98 = vector.load %arg9[%c0_34, %c0_35, %c0_36] : memref<1x1x32xf32, #tpu.memory_space<vmem>>, vector<1x1x32xf32>
    %99 = vector.shape_cast %98 : vector<1x1x32xf32> to vector<1x32xf32>
    %cst_37 = arith.constant dense<0.000000e+00> : vector<16xf32>
    %100 = vector.multi_reduction <add>, %95, %cst_37 [1] : vector<16x32xf32> to vector<16xf32>
    %101 = vector.shape_cast %100 : vector<16xf32> to vector<16x1xf32>
    %cst_38 = arith.constant 3.125000e-02 : f32
    %102 = vector.broadcast %cst_38 : f32 to vector<16x1xf32>
    %103 = arith.mulf %101, %102 : vector<16x1xf32>
    %104 = vector.broadcast %103 : vector<16x1xf32> to vector<16x32xf32>
    %105 = arith.subf %95, %104 : vector<16x32xf32>
    %106 = arith.mulf %105, %105 : vector<16x32xf32>
    %cst_39 = arith.constant dense<0.000000e+00> : vector<16xf32>
    %107 = vector.multi_reduction <add>, %106, %cst_39 [1] : vector<16x32xf32> to vector<16xf32>
    %108 = vector.shape_cast %107 : vector<16xf32> to vector<16x1xf32>
    %cst_40 = arith.constant 3.125000e-02 : f32
    %109 = vector.broadcast %cst_40 : f32 to vector<16x1xf32>
    %110 = arith.mulf %108, %109 : vector<16x1xf32>
    %cst_41 = arith.constant 0.000000e+00 : f32
    %111 = vector.broadcast %cst_41 : f32 to vector<16x1xf32>
    %112 = arith.maximumf %110, %111 : vector<16x1xf32>
    %cst_42 = arith.constant 9.99999974E-6 : f32
    %113 = vector.broadcast %cst_42 : f32 to vector<16x1xf32>
    %114 = arith.addf %112, %113 : vector<16x1xf32>
    %115 = math.rsqrt %114 : vector<16x1xf32>
    %116 = vector.broadcast %115 : vector<16x1xf32> to vector<16x32xf32>
    %117 = arith.mulf %105, %116 : vector<16x32xf32>
    %118 = vector.broadcast %97 : vector<1x32xf32> to vector<16x32xf32>
    %119 = arith.mulf %117, %118 : vector<16x32xf32>
    %120 = vector.broadcast %99 : vector<1x32xf32> to vector<16x32xf32>
    %121 = arith.addf %119, %120 : vector<16x32xf32>
    %122 = arith.truncf %121 : vector<16x32xf32> to vector<16x32xbf16>
    %c0_43 = arith.constant 0 : index
    %c0_44 = arith.constant 0 : index
    %c0_45 = arith.constant 0 : index
    %123 = vector.load %arg10[%c0_43, %c0_44, %c0_45] : memref<1x32x2048xbf16, #tpu.memory_space<vmem>>, vector<1x32x2048xbf16>
    %124 = vector.shape_cast %123 : vector<1x32x2048xbf16> to vector<32x2048xbf16>
    %cst_46 = arith.constant dense<0.000000e+00> : vector<16x2048xf32>
    %125 = tpu.matmul %122, %124, %cst_46 {dimension_numbers = #tpu.dot_dimension_numbers<[1], [0], [0], [1], [0, 0, 1, 1], [], []>} : vector<16x32xbf16>, vector<32x2048xbf16>, vector<16x2048xf32> -> vector<16x2048xf32>
    %c0_47 = arith.constant 0 : index
    %c0_48 = arith.constant 0 : index
    %c0_49 = arith.constant 0 : index
    %126 = vector.load %arg11[%c0_47, %c0_48, %c0_49] : memref<1x1x2048xf32, #tpu.memory_space<vmem>>, vector<1x1x2048xf32>
    %127 = vector.shape_cast %126 : vector<1x1x2048xf32> to vector<1x2048xf32>
    %128 = vector.broadcast %127 : vector<1x2048xf32> to vector<16x2048xf32>
    %129 = arith.addf %125, %128 : vector<16x2048xf32>
    %cst_50 = arith.constant 0.000000e+00 : f32
    %130 = vector.broadcast %cst_50 : f32 to vector<16x2048xf32>
    %131 = arith.maximumf %129, %130 : vector<16x2048xf32>
    %132 = arith.truncf %131 : vector<16x2048xf32> to vector<16x2048xbf16>
    %c0_51 = arith.constant 0 : index
    %c0_52 = arith.constant 0 : index
    %c0_53 = arith.constant 0 : index
    %133 = vector.load %arg12[%c0_51, %c0_52, %c0_53] : memref<1x2048x32xbf16, #tpu.memory_space<vmem>>, vector<1x2048x32xbf16>
    %134 = vector.shape_cast %133 : vector<1x2048x32xbf16> to vector<2048x32xbf16>
    %cst_54 = arith.constant dense<0.000000e+00> : vector<16x32xf32>
    %135 = tpu.matmul %132, %134, %cst_54 {dimension_numbers = #tpu.dot_dimension_numbers<[1], [0], [0], [1], [0, 0, 1, 1], [], []>} : vector<16x2048xbf16>, vector<2048x32xbf16>, vector<16x32xf32> -> vector<16x32xf32>
    %c0_55 = arith.constant 0 : index
    %c0_56 = arith.constant 0 : index
    %c0_57 = arith.constant 0 : index
    %136 = vector.load %arg13[%c0_55, %c0_56, %c0_57] : memref<1x1x32xf32, #tpu.memory_space<vmem>>, vector<1x1x32xf32>
    %137 = vector.shape_cast %136 : vector<1x1x32xf32> to vector<1x32xf32>
    %138 = vector.broadcast %137 : vector<1x32xf32> to vector<16x32xf32>
    %139 = arith.addf %135, %138 : vector<16x32xf32>
    %140 = arith.addf %121, %139 : vector<16x32xf32>
    %c0_58 = arith.constant 0 : index
    %c0_59 = arith.constant 0 : index
    %c0_60 = arith.constant 0 : index
    %141 = vector.load %arg14[%c0_58, %c0_59, %c0_60] : memref<1x1x32xf32, #tpu.memory_space<vmem>>, vector<1x1x32xf32>
    %142 = vector.shape_cast %141 : vector<1x1x32xf32> to vector<1x32xf32>
    %c0_61 = arith.constant 0 : index
    %c0_62 = arith.constant 0 : index
    %c0_63 = arith.constant 0 : index
    %143 = vector.load %arg15[%c0_61, %c0_62, %c0_63] : memref<1x1x32xf32, #tpu.memory_space<vmem>>, vector<1x1x32xf32>
    %144 = vector.shape_cast %143 : vector<1x1x32xf32> to vector<1x32xf32>
    %cst_64 = arith.constant dense<0.000000e+00> : vector<16xf32>
    %145 = vector.multi_reduction <add>, %140, %cst_64 [1] : vector<16x32xf32> to vector<16xf32>
    %146 = vector.shape_cast %145 : vector<16xf32> to vector<16x1xf32>
    %cst_65 = arith.constant 3.125000e-02 : f32
    %147 = vector.broadcast %cst_65 : f32 to vector<16x1xf32>
    %148 = arith.mulf %146, %147 : vector<16x1xf32>
    %149 = vector.broadcast %148 : vector<16x1xf32> to vector<16x32xf32>
    %150 = arith.subf %140, %149 : vector<16x32xf32>
    %151 = arith.mulf %150, %150 : vector<16x32xf32>
    %cst_66 = arith.constant dense<0.000000e+00> : vector<16xf32>
    %152 = vector.multi_reduction <add>, %151, %cst_66 [1] : vector<16x32xf32> to vector<16xf32>
    %153 = vector.shape_cast %152 : vector<16xf32> to vector<16x1xf32>
    %cst_67 = arith.constant 3.125000e-02 : f32
    %154 = vector.broadcast %cst_67 : f32 to vector<16x1xf32>
    %155 = arith.mulf %153, %154 : vector<16x1xf32>
    %cst_68 = arith.constant 0.000000e+00 : f32
    %156 = vector.broadcast %cst_68 : f32 to vector<16x1xf32>
    %157 = arith.maximumf %155, %156 : vector<16x1xf32>
    %cst_69 = arith.constant 9.99999974E-6 : f32
    %158 = vector.broadcast %cst_69 : f32 to vector<16x1xf32>
    %159 = arith.addf %157, %158 : vector<16x1xf32>
    %160 = math.rsqrt %159 : vector<16x1xf32>
    %161 = vector.broadcast %160 : vector<16x1xf32> to vector<16x32xf32>
    %162 = arith.mulf %150, %161 : vector<16x32xf32>
    %163 = vector.broadcast %142 : vector<1x32xf32> to vector<16x32xf32>
    %164 = arith.mulf %162, %163 : vector<16x32xf32>
    %165 = vector.broadcast %144 : vector<1x32xf32> to vector<16x32xf32>
    %166 = arith.addf %164, %165 : vector<16x32xf32>
    %c0_70 = arith.constant 0 : index
    %c0_71 = arith.constant 0 : index
    %167 = vector.load %arg16[%c0_70, %c0_71] : memref<16x32xf32, #tpu.memory_space<vmem>>, vector<16x32xf32>
    tpu.vector_store %arg16[%c0_70, %c0_71], %166 {strides = array<i32>} : memref<16x32xf32, #tpu.memory_space<vmem>>, vector<16x32xf32>,
    return
  }
  func.func @transform_0(%arg0: i32) -> (i32, i32) {
    %c0_i32 = arith.constant 0 : i32
    %c0_i32_0 = arith.constant 0 : i32
    %c0_i32_1 = arith.constant 0 : i32
    return %c0_i32, %c0_i32_0 : i32, i32
  }
  func.func @transform_1(%arg0: i32) -> (i32, i32) {
    %c0_i32 = arith.constant 0 : i32
    %c0_i32_0 = arith.constant 0 : i32
    %c0_i32_1 = arith.constant 0 : i32
    return %c0_i32, %c0_i32_0 : i32, i32
  }
  func.func @transform_2(%arg0: i32) -> (i32, i32) {
    %c0_i32 = arith.constant 0 : i32
    %c0_i32_0 = arith.constant 0 : i32
    %c0_i32_1 = arith.constant 0 : i32
    return %c0_i32, %c0_i32_0 : i32, i32
  }
  func.func @transform_3(%arg0: i32) -> (i32, i32, i32) {
    %c0_i32 = arith.constant 0 : i32
    %c0_i32_0 = arith.constant 0 : i32
    %c0_i32_1 = arith.constant 0 : i32
    return %arg0, %c0_i32, %c0_i32_0 : i32, i32, i32
  }
  func.func @transform_4(%arg0: i32) -> (i32, i32, i32) {
    %c0_i32 = arith.constant 0 : i32
    %c0_i32_0 = arith.constant 0 : i32
    %c0_i32_1 = arith.constant 0 : i32
    return %arg0, %c0_i32, %c0_i32_0 : i32, i32, i32
  }
  func.func @transform_5(%arg0: i32) -> (i32, i32, i32) {
    %c0_i32 = arith.constant 0 : i32
    %c0_i32_0 = arith.constant 0 : i32
    %c0_i32_1 = arith.constant 0 : i32
    return %arg0, %c0_i32, %c0_i32_0 : i32, i32, i32
  }
  func.func @transform_6(%arg0: i32) -> (i32, i32, i32) {
    %c0_i32 = arith.constant 0 : i32
    %c0_i32_0 = arith.constant 0 : i32
    %c0_i32_1 = arith.constant 0 : i32
    return %arg0, %c0_i32, %c0_i32_0 : i32, i32, i32
  }
  func.func @transform_7(%arg0: i32) -> (i32, i32, i32) {
    %c0_i32 = arith.constant 0 : i32
    %c0_i32_0 = arith.constant 0 : i32
    %c0_i32_1 = arith.constant 0 : i32
    return %arg0, %c0_i32, %c0_i32_0 : i32, i32, i32
  }
  func.func @transform_8(%arg0: i32) -> (i32, i32, i32) {
    %c0_i32 = arith.constant 0 : i32
    %c0_i32_0 = arith.constant 0 : i32
    %c0_i32_1 = arith.constant 0 : i32
    return %arg0, %c0_i32, %c0_i32_0 : i32, i32, i32
  }
  func.func @transform_9(%arg0: i32) -> (i32, i32, i32) {
    %c0_i32 = arith.constant 0 : i32
    %c0_i32_0 = arith.constant 0 : i32
    %c0_i32_1 = arith.constant 0 : i32
    return %arg0, %c0_i32, %c0_i32_0 : i32, i32, i32
  }
  func.func @transform_10(%arg0: i32) -> (i32, i32, i32) {
    %c0_i32 = arith.constant 0 : i32
    %c0_i32_0 = arith.constant 0 : i32
    %c0_i32_1 = arith.constant 0 : i32
    return %arg0, %c0_i32, %c0_i32_0 : i32, i32, i32
  }
  func.func @transform_11(%arg0: i32) -> (i32, i32, i32) {
    %c0_i32 = arith.constant 0 : i32
    %c0_i32_0 = arith.constant 0 : i32
    %c0_i32_1 = arith.constant 0 : i32
    return %arg0, %c0_i32, %c0_i32_0 : i32, i32, i32
  }
  func.func @transform_12(%arg0: i32) -> (i32, i32, i32) {
    %c0_i32 = arith.constant 0 : i32
    %c0_i32_0 = arith.constant 0 : i32
    %c0_i32_1 = arith.constant 0 : i32
    return %arg0, %c0_i32, %c0_i32_0 : i32, i32, i32
  }
  func.func @transform_13(%arg0: i32) -> (i32, i32, i32) {
    %c0_i32 = arith.constant 0 : i32
    %c0_i32_0 = arith.constant 0 : i32
    %c0_i32_1 = arith.constant 0 : i32
    return %arg0, %c0_i32, %c0_i32_0 : i32, i32, i32
  }
  func.func @transform_14(%arg0: i32) -> (i32, i32, i32) {
    %c0_i32 = arith.constant 0 : i32
    %c0_i32_0 = arith.constant 0 : i32
    %c0_i32_1 = arith.constant 0 : i32
    return %arg0, %c0_i32, %c0_i32_0 : i32, i32, i32
  }
  func.func @transform_15(%arg0: i32) -> (i32, i32) {
    %c0_i32 = arith.constant 0 : i32
    %c0_i32_0 = arith.constant 0 : i32
    %c0_i32_1 = arith.constant 0 : i32
    return %c0_i32, %c0_i32_0 : i32, i32
  }
}

</mosaic_0001>

<bundles_post_ra>
// kernel: transformer_encoder_forward.1
= control target key start
LH: loop header
LB: loop body
LE: loop exit
PB: predicated region body
PF: predicated region fallthrough
CT: control target
= control target key end

     0   :  { %s4925_s18 = smov 0   ;;  %s5500_s0 = inlined_call_operand.vmem [shape: f32[16,16], index: 0, kind: input, shape index: {}]   ;;  %s5501_s1 = inlined_call_operand.vmem [shape: bf16[16,32], index: 1, kind: input, shape index: {}]   ;;  %s5502_s2 = inlined_call_operand.vmem [shape: f32[1,32], index: 2, kind: input, shape index: {}]   ;;  %s5503_s3 = inlined_call_operand.vmem [shape: bf16[2,32,96], index: 3, kind: input, shape index: {}]   ;;  %s5504_s4 = inlined_call_operand.vmem [shape: f32[2,1,96], index: 4, kind: input, shape index: {}]   ;;  %s5505_s5 = inlined_call_operand.vmem [shape: bf16[2,32,32], index: 5, kind: input, shape index: {}]   ;;  %s5506_s6 = inlined_call_operand.vmem [shape: f32[2,1,32], index: 6, kind: input, shape index: {}]   ;;  %s5507_s7 = inlined_call_operand.vmem [shape: f32[2,1,32], index: 7, kind: input, shape index: {}]   ;;  %s5508_s8 = inlined_call_operand.vmem [shape: f32[2,1,32], index: 8, kind: input, shape index: {}]   ;;  %s5509_s9 = inlined_call_operand.vmem [shape: bf16[2,32,2048], index: 9, kind: input, shape index: {}]   ;;  %s5510_s10 = inlined_call_operand.vmem [shape: f32[2,1,2048], index: 10, kind: input, shape index: {}]   ;;  %s5511_s11 = inlined_call_operand.vmem [shape: bf16[2,2048,32], index: 11, kind: input, shape index: {}]   ;;  %s5512_s12 = inlined_call_operand.vmem [shape: f32[2,1,32], index: 12, kind: input, shape index: {}]   ;;  %s5513_s13 = inlined_call_operand.vmem [shape: f32[2,1,32], index: 13, kind: input, shape index: {}]   ;;  %s5514_s14 = inlined_call_operand.vmem [shape: f32[2,1,32], index: 14, kind: input, shape index: {}]   ;;  %s5515_s15 = inlined_call_operand.vmem [shape: f32[16,32], index: 15, kind: output, shape index: {}]  }
   0x1   :  { %5520 = sst [smem:[#allocation3_spill]] %s5500_s0 }
   0x2   :  { %5521 = sst [smem:[#allocation4_spill]] %s5502_s2 }
   0x3   :  { %5522 = sst [smem:[#allocation5_spill]] %s5503_s3 }
   0x4   :  { %5523 = sst [smem:[#allocation6_spill]] %s5504_s4 }
   0x5   :  { %5524 = sst [smem:[#allocation7_spill]] %s5505_s5 }
   0x6   :  { %5525 = sst [smem:[#allocation8_spill]] %s5515_s15 }
   0x7 LB: > { %5526 = sst [smem:[#allocation2_spill]] %s4824_s18  ;;  %s4047_s19 = sadd.s32 4294967295, %s4824_s18   ;;  %s4824_s18 = sphi %s4925_s18, %s25_s18  }
   0x8   : > { %p4050_p0 = scmp.ge.s32.totalorder %s4824_s18, 1  ;;  %p527_p1 = scmp.lt.s32.totalorder %s4824_s18, 3 }
   0xa   : > { %p528_p2 = pnand %p4050_p0, %p527_p1 }
   0xb   : > { %p610_p3 = scmp.lt.s32.totalorder (!%p528_p2), %s4047_s19, 1  ;;  %s5528_s3 = sld [smem:[#allocation5_spill]] (!%p528_p2) }
   0xc   : > { %531 = sbr.rel (%p528_p2) target bundleno = 4466 (0x1172), region = 80  ;;  %s5529_s5 = sld [smem:[#allocation7_spill]] (!%p528_p2) }
   0xd   : > { %p4060_p4 = scmp.ne.s32.totalorder (!%p528_p2), %s4047_s19, 0 }
  0x13   : > { %s4933_s20 = scalar_select %p610_p3, %s4047_s19, 1 }
  0x14   : > { %659 = sbr.rel (%p4060_p4) target bundleno = 252 (0xfc), region = 84  ;;  %v4628_v0 = vld [vmem:[%s5501_s1] sm:$0xff] (!%p4060_p4)   ;;  %v4826_v1 = vmov (!%p4060_p4), 0.0   ;;  %vm4827_vm0 = vmmov (!%p4060_p4), 0   ;;  %vm678_vm1 = vcmask (!%p4060_p4), 130048   ;;  %s5531_s23 = sld [smem:[#allocation4_spill]] (!%p4060_p4) }
  0x15   : > { %s4263_s21 = sshll.u32 %s4933_s20, 4  ;;  %s4265_s25 = sshll.u32 %s4933_s20, 8  ;;  %4483 = vmatprep.subr.bf16.mxu0 (!%p4060_p4), %v4826_v1  ;;  %4485 = vmatprep.mubr.msk.bf16.mxu0 (!%p4060_p4), %vm4827_vm0, %v4826_v1  ;;  %vm723_vm2 = vcmask (!%p4060_p4), 261120  }
  0x16   : > { %s4943_s27 = scalar_lea.vmem %s5528_s3, %s4263_s21  ;;  %s4948_s30 = scalar_lea.vmem %s5529_s5, %s4263_s21  ;;  %4484 = vmatpush3.bf16.msra.mxu0 (!%p4060_p4), %v4628_v0 }
  0x17   : > { %s4966_s4 = scalar_lea.vmem %s5509_s9, %s4265_s25  ;;  %s4971_s5 = scalar_lea.vmem %s5510_s10, %s4263_s21 }
  0x18   : > { %s4266_s16 = sshll.u32 %s4933_s20, 10  ;;  %s648_s2 = scalar_lea.vmem %s5512_s12, %s4933_s20 }
  0x19   : > { %s4981_s22 = scalar_lea.vmem %s5511_s11, %s4266_s16  ;;  %s651_s3 = scalar_lea.vmem %s5513_s13, %s4933_s20 }
  0x1a   : > { %s654_s28 = scalar_lea.vmem %s5514_s14, %s4933_s20  ;;  %s5530_s16 = sld [smem:[#allocation3_spill]] (!%p4060_p4)  ;;  %v4061_v5 = vld [vmem:[%s5531_s23] ss:$0 sm:$0xff] (!%p4060_p4) }
  0x1b   : > { %s5532_s21 = sld [smem:[#allocation8_spill]] }
  0x20   : > { %v660_v2 = vld [vmem:[%s5530_s16] sm:$0xff]  ;;  %v661_v3 = vld [vmem:[%s5530_s16 + $0x8] sm:$0xff] }
  0x21   : > { %v662_v4 = vpack.c.bf16 %v661_v3, %v660_v2 }
  0x23   : > { %4486 = vmatmul.mubr.msk.bf16.vlgmr.msra.gmra.mrb[0].mxu0 %vm678_vm1, %v662_v4 }
  0xf6   : > { %v716_v6 = vpop.f32.mrb[0].mxu0 }
  0xf7   : > { %v717_v7 = vadd.f32 %v4061_v5, %v716_v6  ;;  %v4487_v8 = vpop.f32.mrb[1].mxu0 }
  0xf8   : > { %v719_v9 = vpop.f32.mrb[2].mxu0 }
  0xf9   : > { %724 = vst.msk [vmem:[%s5532_s21] sm:$0xff] %vm723_vm2, %v717_v7  ;;  %v720_v10 = vadd.f32 %v4061_v5, %v719_v9  ;;  %v4488_v11 = vpop.f32.mrb[3].mxu0 }
  0xfb   : > { %725 = vst.msk [vmem:[%s5532_s21 + $0x8] sm:$0xff] %vm723_vm2, %v720_v10 }
  0xfc PF: > { %v4644_v12 = vld [vmem:[%s4943_s27] sm:$0xff]   ;;  %v4828_v13 = vmov 0.0   ;;  %v4645_v14 = vld [vmem:[%s4943_s27 + $0x8] sm:$0xff]   ;;  %vm4829_vm3 = vmmov 0   ;;  %s5533_s15 = sld [smem:[#allocation8_spill]]  ;;  %vm752_vm4 = vcmask 261120  }
  0xfd   : > { %4489 = vmatprep.subr.bf16.mxu0 %v4828_v13  ;;  %4497 = vmatprep.subr.bf16.mxu1 %v4828_v13  ;;  %s5534_s25 = sld [smem:[#allocation6_spill]]  ;;  %s4830_s21 = smov 96   ;;  %vm802_vm5 = vcmask 64512   ;;  %vm927_vm6 = vcmask 1043456   ;;  %vm1705_vm7 = vcmask 130048   ;;  %vm1708_vm8 = vcmask 195584  }
  0xfe   : > { %4490 = vmatpush3.bf16.msra.mxu0 %v4644_v12  ;;  %4493 = vmatprep.mubr.msk.bf16.mxu0 %vm4829_vm3, %v4828_v13  ;;  %s4831_s29 = smov 64   ;;  %s4832_s18 = smov 88  }
  0xff   : > { %4491 = vmatprep.subr.bf16.mxu0 %v4828_v13  ;;  %4499 = vmatprep.mubr.msk.bf16.mxu1 %vm4829_vm3, %v4828_v13  ;;  %s4833_s0 = smov 120   ;;  %s4834_s17 = smov 56  }
 0x100   : > { %s4835_s19 = smov 80   ;;  %s4836_s24 = smov 112  }
 0x101   : > { %s4837_s27 = smov 48   ;;  %s4838_s23 = smov 72  }
 0x102   : > { %v726_v15 = vld [vmem:[%s5533_s15] sm:$0xff]  ;;  %v727_v16 = vld [vmem:[%s5533_s15 + $0x8] sm:$0xff]  ;;  %4492 = vmatpush3.bf16.msra.mxu0 %v4645_v14 }
 0x103   : > { %v728_v17 = vpack.c.bf16 %v727_v16, %v726_v15  ;;  %4503 = vmatprep.subr.bf16.mxu0 %v4828_v13  ;;  %s5535_s26 = scalar_lea.vmem %s5534_s25, %s4933_s20  ;;  %s4839_s25 = smov 104  }
 0x104   : > { %v4064_v18 = vld [vmem:[%s5535_s26] ss:$0 sm:$0xff]  ;;  %s4840_s26 = smov 40  }
 0x105   : > { %4494 = vmatmul.mubr.msk.bf16.vlgmr.msra.gmra.mrb[0].mxu0 %vm752_vm4, %v728_v17 }
 0x106   : > { %4505 = vmatprep.mubr.msk.bf16.mxu0 %vm4829_vm3, %v4828_v13 }
 0x1d8   : > { %v790_v19 = vpop.f32.mrb[0].mxu0 }
 0x1d9   : > { %v791_v20 = vadd.f32 %v4064_v18, %v790_v19  ;;  %v4495_v21 = vpop.f32.mrb[1].mxu0 }
 0x1da   : > { %v793_v22 = vpop.f32.mrb[2].mxu0 }
 0x1db   : > { %v5033_v23 = vpack.c.bf16 %v791_v20, %v791_v20  ;;  %v794_v24 = vadd.f32 %v4064_v18, %v793_v22  ;;  %v4496_v25 = vpop.f32.mrb[3].mxu0 }
 0x1dd   : > { %800 = vrot.lane.b32.xlu0 %v5033_v23, %s4830_s21  ;;  %v5036_v26 = vpack.c.bf16 %v794_v24, %v794_v24 }
 0x1e1   : > { %850 = vrot.lane.b32.xlu0 %v5036_v26, %s4830_s21  ;;  %s4841_s21 = smov 8  }
 0x24f   : > { %v801_v27 = vpop.permute.xlu0 %800 }
 0x250   : > { %v807_v28 = vsel %vm802_vm5, %v801_v27, 0 }
 0x251   : > { %4498 = vmatpush3.bf16.xpose.msra.mxu1 %v807_v28 }
 0x252   : > { %4509 = vmatprep.subr.bf16.mxu1 %v4828_v13 }
 0x253   : > { %v851_v29 = vpop.permute.xlu0 %850 }
 0x254   : > { %v856_v30 = vsel %vm802_vm5, %v851_v29, 0 }
 0x255   : > { %4504 = vmatpush3.bf16.xpose.msra.mxu0 %v856_v30 }
 0x256   : > { %4515 = vmatprep.subr.bf16.mxu0 %v4828_v13 }
 0x258   : > { %4500 = vmatmul.mubr.msk.bf16.vlgmr.msra.gmra.mrb[0].mxu1 %vm802_vm5, %v5033_v23 }
 0x259   : > { %4511 = vmatprep.mubr.msk.bf16.mxu1 %vm4829_vm3, %v4828_v13 }
 0x25c   : > { %4506 = vmatmul.mubr.msk.bf16.vlgmr.msra.gmra.mrb[4].mxu0 %vm802_vm5, %v5036_v26 }
 0x25d   : > { %4517 = vmatprep.mubr.msk.bf16.mxu0 %vm4829_vm3, %v4828_v13 }
 0x32b   : > { %v843_v31 = vpop.f32.mrb[0].mxu1 }
 0x32c   : > { %v4501_v32 = vpop.f32.mrb[1].mxu1  ;;  %v898_v33 = vsel %vm802_vm5, %v843_v31, -inf }
 0x32d   : > { %899 = vmax.xlane.f32.xlu1 %v898_v33  ;;  %v846_v34 = vpop.f32.mrb[2].mxu1 }
 0x32e   : > { %v4502_v35 = vpop.f32.mrb[3].mxu1 }
 0x32f   : > { %v892_v36 = vpop.f32.mrb[4].mxu0 }
 0x330   : > { %v4507_v37 = vpop.f32.mrb[5].mxu0  ;;  %v901_v38 = vsel %vm802_vm5, %v892_v36, -inf }
 0x331   : > { %902 = vmax.xlane.f32.xlu1 %v901_v38  ;;  %v895_v39 = vpop.f32.mrb[6].mxu0 }
 0x332   : > { %v4508_v40 = vpop.f32.mrb[7].mxu0 }
 0x342   : > { %922 = vrot.lane.b32.xlu1 %v5033_v23, %s4831_s29 }
 0x346   : > { %971 = vrot.lane.b32.xlu1 %v5036_v26, %s4831_s29  ;;  %s4842_s29 = smov 16  }
 0x34a   : > { %1021 = vrot.lane.b32.xlu1 %v5033_v23, %s4832_s18 }
 0x3ba   : > { %v900_v41 = vpop.xlane.xlu1 %899 }
 0x3bb   : > { %v904_v42 = vsub.f32 %v843_v31, %v900_v41 }
 0x3bd   : > { %v906_v43 = vmul.f32 1.442695, %v904_v42 }
 0x3be   : > { %v903_v44 = vpop.xlane.xlu1 %902 }
 0x3bf   : > { %4776 = vpow2.f32 %v906_v43  ;;  %v905_v45 = vsub.f32 %v892_v36, %v903_v44 }
 0x3c1   : > { %v908_v46 = vmul.f32 1.442695, %v905_v45 }
 0x3c2   : > { %v923_v47 = vpop.permute.xlu1 %922 }
 0x3c3   : > { %4778 = vpow2.f32 %v908_v46  ;;  %v929_v48 = vsel %vm927_vm6, %v923_v47, 0 }
 0x3c4   : > { %4510 = vmatpush3.bf16.msra.mxu1 %v929_v48 }
 0x3c5   : > { %4521 = vmatprep.subr.bf16.mxu1 %v4828_v13 }
 0x3c6   : > { %v972_v49 = vpop.permute.xlu1 %971 }
 0x3c7   : > { %v977_v50 = vsel %vm927_vm6, %v972_v49, 0 }
 0x3c8   : > { %4516 = vmatpush3.bf16.msra.mxu0 %v977_v50 }
 0x3c9   : > { %v4777_v51 = vpop.eup %4776  ;;  %4527 = vmatprep.subr.bf16.mxu0 %v4828_v13 }
 0x3ca   : > { %v910_v52 = vsel %vm802_vm5, %v4777_v51, 0.0  ;;  %v1022_v55 = vpop.permute.xlu1 %1021 }
 0x3cb   : > { %911 = vadd.xlane.f32.xlu0 %v910_v52  ;;  %v1027_v62 = vsel %vm802_vm5, %v1022_v55, 0 }
 0x3cd   : > { %v4779_v53 = vpop.eup %4778 }
 0x3ce   : > { %v913_v54 = vsel %vm802_vm5, %v4779_v53, 0.0 }
 0x3cf   : > { %914 = vadd.xlane.f32.xlu1 %v913_v54 }
 0x3e0   : > { %1071 = vrot.lane.b32.xlu1 %v5036_v26, %s4832_s18  ;;  %s4843_s18 = smov 24  }
 0x3e1   : > { %1019 = vrot.lane.b32.xlu0 %v5033_v23, %s4833_s0 }
 0x3e4   : > { %1069 = vrot.lane.b32.xlu1 %v5036_v26, %s4833_s0 }
 0x458   : > { %v912_v56 = vpop.xlane.xlu0 %911 }
 0x459   : > { %4780 = vrcp.f32 %v912_v56 }
 0x45c   : > { %v915_v57 = vpop.xlane.xlu1 %914  ;;  %v1020_v3 = vpop.permute.xlu0 %1019 }
 0x45d   : > { %4782 = vrcp.f32 %v915_v57 }
 0x460   : > { %v1072_v0 = vpop.permute.xlu1 %1071 }
 0x461   : > { %v1077_v2 = vsel %vm802_vm5, %v1072_v0, 0 }
 0x463   : > { %v4781_v58 = vpop.eup %4780 }
 0x464   : > { %v917_v59 = vmul.f32 %v4781_v58, %v4777_v51  ;;  %v1070_v4 = vpop.permute.xlu1 %1069 }
 0x466   : > { %v920_v60 = vpack.c.bf16 %v917_v59, %v917_v59 }
 0x467   : > { %v4783_v61 = vpop.eup %4782 }
 0x468   : > { %v919_v63 = vmul.f32 %v4783_v61, %v4779_v53  ;;  %4512 = vmatmul.mubr.msk.bf16.vlgmr.msra.gmra.mrb[4].mxu1 %vm802_vm5, %v920_v60 }
 0x469   : > { %4522 = vmatpush3.bf16.xpose.msra.mxu1 %v1027_v62  ;;  %4523 = vmatprep.mubr.msk.bf16.mxu1 %vm4829_vm3, %v4828_v13 }
 0x46a   : > { %v921_v1 = vpack.c.bf16 %v919_v63, %v919_v63  ;;  %4533 = vmatprep.subr.bf16.mxu1 %v4828_v13 }
 0x46c   : > { %4518 = vmatmul.mubr.msk.bf16.vlgmr.msra.gmra.mrb[8].mxu0 %vm802_vm5, %v921_v1 }
 0x46d   : > { %4528 = vmatpush3.bf16.xpose.msra.mxu0 %v1077_v2  ;;  %4529 = vmatprep.mubr.msk.bf16.mxu0 %vm4829_vm3, %v4828_v13 }
 0x46e   : > { %4539 = vmatprep.subr.bf16.mxu0 %v4828_v13 }
 0x470   : > { %4524 = vmatmul.mubr.msk.bf16.vlgmr.msra.gmra.mrb[8].mxu1 %vm802_vm5, %v1020_v3 }
 0x471   : > { %4535 = vmatprep.mubr.msk.bf16.mxu1 %vm4829_vm3, %v4828_v13 }
 0x474   : > { %4530 = vmatmul.mubr.msk.bf16.vlgmr.msra.gmra.mrb[12].mxu0 %vm802_vm5, %v1070_v4 }
 0x475   : > { %4541 = vmatprep.mubr.msk.bf16.mxu0 %vm4829_vm3, %v4828_v13 }
 0x53b   : > { %v5081_v5 = vpop.f32.mrb[4].mxu1 }
 0x53c   : > { %v4513_v6 = vpop.f32.mrb[5].mxu1 }
 0x53d   : > { %v968_v7 = vpop.f32.mrb[6].mxu1 }
 0x53e   : > { %v4514_v8 = vpop.f32.mrb[7].mxu1 }
 0x53f   : > { %v5083_v9 = vpop.f32.mrb[8].mxu0 }
 0x540   : > { %v4519_v10 = vpop.f32.mrb[9].mxu0 }
 0x541   : > { %v1016_v11 = vpop.f32.mrb[10].mxu0 }
 0x542   : > { %v4520_v12 = vpop.f32.mrb[11].mxu0 }
 0x543   : > { %v1063_v14 = vpop.f32.mrb[8].mxu1 }
 0x544   : > { %v4525_v15 = vpop.f32.mrb[9].mxu1  ;;  %v1119_v16 = vsel %vm802_vm5, %v1063_v14, -inf }
 0x545   : > { %1120 = vmax.xlane.f32.xlu1 %v1119_v16  ;;  %v1066_v17 = vpop.f32.mrb[10].mxu1 }
 0x546   : > { %v4526_v18 = vpop.f32.mrb[11].mxu1 }
 0x547   : > { %v1113_v19 = vpop.f32.mrb[12].mxu0 }
 0x548   : > { %v4531_v20 = vpop.f32.mrb[13].mxu0  ;;  %v1122_v21 = vsel %vm802_vm5, %v1113_v19, -inf }
 0x549   : > { %1123 = vmax.xlane.f32.xlu0 %v1122_v21  ;;  %v1116_v22 = vpop.f32.mrb[14].mxu0 }
 0x54a   : > { %v4532_v24 = vpop.f32.mrb[15].mxu0 }
 0x556   : > { %1143 = vrot.lane.b32.xlu1 %v5033_v23, %s4834_s17 }
 0x55a   : > { %1241 = vrot.lane.b32.xlu1 %v5033_v23, %s4835_s19 }
 0x55f   : > { %1191 = vrot.lane.b32.xlu0 %v5036_v26, %s4834_s17  ;;  %s5536_s17 = scalar_lea.vmem %s5506_s6, %s4933_s20 }
 0x563   : > { %1239 = vrot.lane.b32.xlu0 %v5033_v23, %s4836_s24 }
 0x5d2   : > { %v1121_v25 = vpop.xlane.xlu1 %1120 }
 0x5d3   : > { %v1125_v27 = vsub.f32 %v1063_v14, %v1121_v25 }
 0x5d5   : > { %v1127_v28 = vmul.f32 1.442695, %v1125_v27 }
 0x5d6   : > { %v1144_v29 = vpop.permute.xlu1 %1143  ;;  %v1124_v30 = vpop.xlane.xlu0 %1123 }
 0x5d7   : > { %4784 = vpow2.f32 %v1127_v28  ;;  %v1149_v31 = vsel %vm927_vm6, %v1144_v29, 0  ;;  %v1126_v32 = vsub.f32 %v1113_v19, %v1124_v30 }
 0x5d8   : > { %4534 = vmatpush3.bf16.msra.mxu1 %v1149_v31 }
 0x5d9   : > { %v1129_v33 = vmul.f32 1.442695, %v1126_v32  ;;  %4545 = vmatprep.subr.bf16.mxu1 %v4828_v13 }
 0x5da   : > { %v1192_v34 = vpop.permute.xlu0 %1191  ;;  %v1242_v40 = vpop.permute.xlu1 %1241 }
 0x5db   : > { %4786 = vpow2.f32 %v1129_v33  ;;  %v1197_v35 = vsel %vm927_vm6, %v1192_v34, 0  ;;  %v1247_v47 = vsel %vm802_vm5, %v1242_v40, 0 }
 0x5dc   : > { %4540 = vmatpush3.bf16.msra.mxu0 %v1197_v35 }
 0x5dd   : > { %4551 = vmatprep.subr.bf16.mxu0 %v4828_v13 }
 0x5de   : > { %v1240_v52 = vpop.permute.xlu0 %1239 }
 0x5e1   : > { %v4785_v36 = vpop.eup %4784 }
 0x5e2   : > { %v1131_v37 = vsel %vm802_vm5, %v4785_v36, 0.0 }
 0x5e3   : > { %1132 = vadd.xlane.f32.xlu1 %v1131_v37 }
 0x5e5   : > { %v4787_v38 = vpop.eup %4786 }
 0x5e6   : > { %v1134_v39 = vsel %vm802_vm5, %v4787_v38, 0.0 }
 0x5e7   : > { %1135 = vadd.xlane.f32.xlu1 %v1134_v39 }
 0x5f8   : > { %1291 = vrot.lane.b32.xlu1 %v5036_v26, %s4835_s19 }
 0x5fc   : > { %1289 = vrot.lane.b32.xlu1 %v5036_v26, %s4836_s24 }
 0x670   : > { %v1133_v41 = vpop.xlane.xlu1 %1132 }
 0x671   : > { %4788 = vrcp.f32 %v1133_v41 }
 0x674   : > { %v1136_v42 = vpop.xlane.xlu1 %1135 }
 0x675   : > { %4790 = vrcp.f32 %v1136_v42 }
 0x678   : > { %v1292_v49 = vpop.permute.xlu1 %1291 }
 0x679   : > { %v1297_v51 = vsel %vm802_vm5, %v1292_v49, 0 }
 0x67b   : > { %v4789_v43 = vpop.eup %4788 }
 0x67c   : > { %v1138_v44 = vmul.f32 %v4789_v43, %v4785_v36  ;;  %v1290_v53 = vpop.permute.xlu1 %1289 }
 0x67e   : > { %v1141_v45 = vpack.c.bf16 %v1138_v44, %v1138_v44 }
 0x67f   : > { %v4791_v46 = vpop.eup %4790 }
 0x680   : > { %v1140_v48 = vmul.f32 %v4791_v46, %v4787_v38  ;;  %4536 = vmatmul.mubr.msk.bf16.vlgmr.msra.gmra.mrb[12].mxu1 %vm802_vm5, %v1141_v45 }
 0x681   : > { %4546 = vmatpush3.bf16.xpose.msra.mxu1 %v1247_v47  ;;  %4547 = vmatprep.mubr.msk.bf16.mxu1 %vm4829_vm3, %v4828_v13 }
 0x682   : > { %v1142_v50 = vpack.c.bf16 %v1140_v48, %v1140_v48  ;;  %4557 = vmatprep.subr.bf16.mxu1 %v4828_v13 }
 0x684   : > { %4542 = vmatmul.mubr.msk.bf16.vlgmr.msra.gmra.mrb[16].mxu0 %vm802_vm5, %v1142_v50 }
 0x685   : > { %4552 = vmatpush3.bf16.xpose.msra.mxu0 %v1297_v51  ;;  %4553 = vmatprep.mubr.msk.bf16.mxu0 %vm4829_vm3, %v4828_v13 }
 0x686   : > { %4563 = vmatprep.subr.bf16.mxu0 %v4828_v13 }
 0x688   : > { %4548 = vmatmul.mubr.msk.bf16.vlgmr.msra.gmra.mrb[16].mxu1 %vm802_vm5, %v1240_v52 }
 0x689   : > { %4559 = vmatprep.mubr.msk.bf16.mxu1 %vm4829_vm3, %v4828_v13 }
 0x68c   : > { %4554 = vmatmul.mubr.msk.bf16.vlgmr.msra.gmra.mrb[20].mxu0 %vm802_vm5, %v1290_v53 }
 0x68d   : > { %4565 = vmatprep.mubr.msk.bf16.mxu0 %vm4829_vm3, %v4828_v13 }
 0x753   : > { %v5115_v54 = vpop.f32.mrb[12].mxu1 }
 0x754   : > { %v4537_v55 = vpop.f32.mrb[13].mxu1 }
 0x755   : > { %v1188_v56 = vpop.f32.mrb[14].mxu1 }
 0x756   : > { %v4538_v57 = vpop.f32.mrb[15].mxu1 }
 0x757   : > { %v5117_v58 = vpop.f32.mrb[16].mxu0 }
 0x758   : > { %v4629_v59 = vpack.i.bf16 %v5117_v58, %v5115_v54  ;;  %v4543_v60 = vpop.f32.mrb[17].mxu0 }
 0x759   : > { %v1236_v61 = vpop.f32.mrb[18].mxu0 }
 0x75a   : > { %v4544_v62 = vpop.f32.mrb[19].mxu0 }
 0x75b   : > { %v1283_v63 = vpop.f32.mrb[16].mxu1 }
 0x75c   : > { %v4549_v0 = vpop.f32.mrb[17].mxu1  ;;  %v1339_v1 = vsel %vm802_vm5, %v1283_v63, -inf }
 0x75d   : > { %1340 = vmax.xlane.f32.xlu0 %v1339_v1  ;;  %v1286_v2 = vpop.f32.mrb[18].mxu1 }
 0x75e   : > { %v4550_v3 = vpop.f32.mrb[19].mxu1 }
 0x75f   : > { %v1333_v4 = vpop.f32.mrb[20].mxu0 }
 0x760   : > { %v4555_v6 = vpop.f32.mrb[21].mxu0  ;;  %v1342_v7 = vsel %vm802_vm5, %v1333_v4, -inf }
 0x761   : > { %1343 = vmax.xlane.f32.xlu1 %v1342_v7  ;;  %v1336_v8 = vpop.f32.mrb[22].mxu0 }
 0x762   : > { %v4556_v10 = vpop.f32.mrb[23].mxu0 }
 0x772   : > { %1363 = vrot.lane.b32.xlu1 %v5033_v23, %s4837_s27 }
 0x776   : > { %1461 = vrot.lane.b32.xlu1 %v5033_v23, %s4838_s23 }
 0x77a   : > { %1511 = vrot.lane.b32.xlu1 %v5036_v26, %s4838_s23 }
 0x77e   : > { %1509 = vrot.lane.b32.xlu1 %v5036_v26, %s4839_s25 }
 0x7ea   : > { %v1341_v11 = vpop.xlane.xlu0 %1340 }
 0x7eb   : > { %v1345_v12 = vsub.f32 %v1283_v63, %v1341_v11 }
 0x7ed   : > { %v1347_v14 = vmul.f32 1.442695, %v1345_v12 }
 0x7ee   : > { %v1344_v15 = vpop.xlane.xlu1 %1343 }
 0x7ef   : > { %4792 = vpow2.f32 %v1347_v14  ;;  %v1346_v16 = vsub.f32 %v1333_v4, %v1344_v15 }
 0x7f1   : > { %v1349_v17 = vmul.f32 1.442695, %v1346_v16 }
 0x7f2   : > { %v1364_v18 = vpop.permute.xlu1 %1363 }
 0x7f3   : > { %4794 = vpow2.f32 %v1349_v17  ;;  %v1369_v19 = vsel %vm927_vm6, %v1364_v18, 0 }
 0x7f4   : > { %4558 = vmatpush3.bf16.msra.mxu1 %v1369_v19 }
 0x7f5   : > { %4569 = vmatprep.subr.bf16.mxu1 %v4828_v13 }
 0x7f6   : > { %v1462_v31 = vpop.permute.xlu1 %1461 }
 0x7f7   : > { %v1467_v35 = vsel %vm802_vm5, %v1462_v31, 0 }
 0x7f9   : > { %v4793_v20 = vpop.eup %4792 }
 0x7fa   : > { %v1351_v21 = vsel %vm802_vm5, %v4793_v20, 0.0  ;;  %v1512_v37 = vpop.permute.xlu1 %1511 }
 0x7fb   : > { %1352 = vadd.xlane.f32.xlu0 %v1351_v21  ;;  %v1517_v39 = vsel %vm802_vm5, %v1512_v37, 0  ;;  %v4647_v21 = vld [vmem:[%s4948_s30 + $0x8] sm:$0xff]  }
 0x7fd   : > { %v4795_v22 = vpop.eup %4794 }
 0x7fe   : > { %v1354_v24 = vsel %vm802_vm5, %v4795_v22, 0.0  ;;  %v1510_v41 = vpop.permute.xlu1 %1509 }
 0x7ff   : > { %1355 = vadd.xlane.f32.xlu0 %v1354_v24 }
 0x815   : > { %1411 = vrot.lane.b32.xlu0 %v5036_v26, %s4837_s27 }
 0x819   : > { %1459 = vrot.lane.b32.xlu0 %v5033_v23, %s4839_s25 }
 0x888   : > { %v1353_v25 = vpop.xlane.xlu0 %1352 }
 0x889   : > { %4796 = vrcp.f32 %v1353_v25 }
 0x88c   : > { %v1356_v27 = vpop.xlane.xlu0 %1355 }
 0x88d   : > { %4798 = vrcp.f32 %v1356_v27 }
 0x890   : > { %v1412_v28 = vpop.permute.xlu0 %1411 }
 0x891   : > { %v1417_v29 = vsel %vm927_vm6, %v1412_v28, 0 }
 0x892   : > { %4564 = vmatpush3.bf16.msra.mxu0 %v1417_v29 }
 0x893   : > { %v4797_v30 = vpop.eup %4796  ;;  %4575 = vmatprep.subr.bf16.mxu0 %v4828_v13 }
 0x894   : > { %v1358_v32 = vmul.f32 %v4797_v30, %v4793_v20  ;;  %v1460_v40 = vpop.permute.xlu0 %1459  ;;  %v4646_v20 = vld [vmem:[%s4948_s30] sm:$0xff]   ;;  %s5538_s30 = scalar_lea.vmem %s5508_s8, %s4933_s20 }
 0x896   : > { %v1361_v33 = vpack.c.bf16 %v1358_v32, %v1358_v32 }
 0x897   : > { %v4799_v34 = vpop.eup %4798 }
 0x898   : > { %v1360_v36 = vmul.f32 %v4799_v34, %v4795_v22  ;;  %4560 = vmatmul.mubr.msk.bf16.vlgmr.msra.gmra.mrb[20].mxu1 %vm802_vm5, %v1361_v33 }
 0x899   : > { %4570 = vmatpush3.bf16.xpose.msra.mxu1 %v1467_v35  ;;  %4571 = vmatprep.mubr.msk.bf16.mxu1 %vm4829_vm3, %v4828_v13 }
 0x89a   : > { %v1362_v38 = vpack.c.bf16 %v1360_v36, %v1360_v36  ;;  %4581 = vmatprep.subr.bf16.mxu1 %v4828_v13 }
 0x89c   : > { %4566 = vmatmul.mubr.msk.bf16.vlgmr.msra.gmra.mrb[24].mxu0 %vm802_vm5, %v1362_v38 }
 0x89d   : > { %4576 = vmatpush3.bf16.xpose.msra.mxu0 %v1517_v39  ;;  %4577 = vmatprep.mubr.msk.bf16.mxu0 %vm4829_vm3, %v4828_v13 }
 0x89e   : > { %4587 = vmatprep.subr.bf16.mxu0 %v4828_v13 }
 0x8a0   : > { %4572 = vmatmul.mubr.msk.bf16.vlgmr.msra.gmra.mrb[24].mxu1 %vm802_vm5, %v1460_v40 }
 0x8a1   : > { %4583 = vmatprep.mubr.msk.bf16.mxu1 %vm4829_vm3, %v4828_v13 }
 0x8a4   : > { %4578 = vmatmul.mubr.msk.bf16.vlgmr.msra.gmra.mrb[28].mxu0 %vm802_vm5, %v1510_v41 }
 0x8a5   : > { %4589 = vmatprep.mubr.msk.bf16.mxu0 %vm4829_vm3, %v4828_v13 }
 0x96b   : > { %v1405_v42 = vpop.f32.mrb[20].mxu1 }
 0x96c   : > { %v4561_v43 = vpop.f32.mrb[21].mxu1 }
 0x96d   : > { %v1408_v44 = vpop.f32.mrb[22].mxu1 }
 0x96e   : > { %v4562_v45 = vpop.f32.mrb[23].mxu1 }
 0x96f   : > { %v1453_v46 = vpop.f32.mrb[24].mxu0 }
 0x970   : > { %v4634_v47 = vpack.i.bf16 %v1453_v46, %v1405_v42  ;;  %v4567_v48 = vpop.f32.mrb[25].mxu0 }
 0x971   : > { %v1456_v49 = vpop.f32.mrb[26].mxu0  ;;  %v4084_v48 = vld [vmem:[%s5536_s17] ss:$0 sm:$0xff] }
 0x972   : > { %v4568_v50 = vpop.f32.mrb[27].mxu0 }
 0x973   : > { %v1503_v51 = vpop.f32.mrb[24].mxu1 }
 0x974   : > { %v4573_v52 = vpop.f32.mrb[25].mxu1  ;;  %v1559_v53 = vsel %vm802_vm5, %v1503_v51, -inf }
 0x975   : > { %1560 = vmax.xlane.f32.xlu0 %v1559_v53  ;;  %v1506_v55 = vpop.f32.mrb[26].mxu1  ;;  %v4816_v53 = vld [vmem:[%s5533_s15] sm:$0xff] }
 0x976   : > { %v4574_v56 = vpop.f32.mrb[27].mxu1 }
 0x977   : > { %v1553_v57 = vpop.f32.mrb[28].mxu0 }
 0x978   : > { %v4579_v60 = vpop.f32.mrb[29].mxu0  ;;  %v1562_v61 = vsel %vm802_vm5, %v1553_v57, -inf }
 0x979   : > { %1563 = vmax.xlane.f32.xlu1 %v1562_v61  ;;  %v1556_v62 = vpop.f32.mrb[30].mxu0 }
 0x97a   : > { %v4580_v63 = vpop.f32.mrb[31].mxu0 }
 0x98a   : > { %1583 = vrot.lane.b32.xlu1 %v5033_v23, %s4840_s26 }
 0x98e   : > { %4630 = vrot.lane.b32.xlu1 %v4629_v59, %s4841_s21  ;;  %s5537_s21 = scalar_lea.vmem %s5507_s7, %s4933_s20 }
 0x992   : > { %4635 = vrot.lane.b32.xlu1 %v4634_v47, %s4842_s29 }
 0xa02   : > { %v1561_v0 = vpop.xlane.xlu0 %1560 }
 0xa03   : > { %v1565_v1 = vsub.f32 %v1503_v51, %v1561_v0 }
 0xa05   : > { %v1567_v2 = vmul.f32 1.442695, %v1565_v1 }
 0xa06   : > { %v1564_v3 = vpop.xlane.xlu1 %1563 }
 0xa07   : > { %4800 = vpow2.f32 %v1567_v2  ;;  %v1566_v4 = vsub.f32 %v1553_v57, %v1564_v3  ;;  %v4817_v57 = vld [vmem:[%s5533_s15 + $0x8] sm:$0xff] }
 0xa09   : > { %v1569_v6 = vmul.f32 1.442695, %v1566_v4 }
 0xa0a   : > { %v1584_v7 = vpop.permute.xlu1 %1583 }
 0xa0b   : > { %4802 = vpow2.f32 %v1569_v6  ;;  %v1589_v8 = vsel %vm927_vm6, %v1584_v7, 0 }
 0xa0c   : > { %4582 = vmatpush3.bf16.msra.mxu1 %v1589_v8 }
 0xa0d   : > { %4593 = vmatprep.subr.bf16.mxu1 %v4828_v13 }
 0xa0e   : > { %v4631_v33 = vpop.permute.xlu1 %4630 }
 0xa0f   : > { %v4633_v35 = vunpack.i.h.bf16 %v4631_v33  ;;  %v4632_v36 = vunpack.i.l.bf16 %v4631_v33 }
 0xa11   : > { %v4801_v23 = vpop.eup %4800  ;;  %v1704_v39 = vsel %vm802_vm5, %v5083_v9, %v4633_v35  ;;  %v1703_v40 = vsel %vm802_vm5, %v5081_v5, %v4632_v36 }
 0xa12   : > { %v1571_v54 = vsel %vm802_vm5, %v4801_v23, 0.0  ;;  %v4636_v34 = vpop.permute.xlu1 %4635 }
 0xa13   : > { %1572 = vadd.xlane.f32.xlu0 %v1571_v54  ;;  %v4638_v37 = vunpack.i.h.bf16 %v4636_v34  ;;  %v1836_v54 = vld [vmem:[%s4966_s4 + $0x40] sm:$0xff] }
 0xa15   : > { %v4803_v58 = vpop.eup %4802  ;;  %v1707_v44 = vsel %vm1705_vm7, %v1704_v39, %v4638_v37 }
 0xa16   : > { %v1574_v59 = vsel %vm802_vm5, %v4803_v58, 0.0 }
 0xa17   : > { %1575 = vadd.xlane.f32.xlu0 %v1574_v59 }
 0xa2d   : > { %1631 = vrot.lane.b32.xlu0 %v5036_v26, %s4840_s26 }
 0xaa0   : > { %v1573_v10 = vpop.xlane.xlu0 %1572 }
 0xaa1   : > { %4804 = vrcp.f32 %v1573_v10  ;;  %v1837_v10 = vld [vmem:[%s4966_s4 + $0x48] sm:$0xff] }
 0xaa4   : > { %v1576_v11 = vpop.xlane.xlu0 %1575 }
 0xaa5   : > { %4806 = vrcp.f32 %v1576_v11 }
 0xaa8   : > { %v1632_v12 = vpop.permute.xlu0 %1631 }
 0xaa9   : > { %v1637_v14 = vsel %vm927_vm6, %v1632_v12, 0 }
 0xaaa   : > { %4588 = vmatpush3.bf16.msra.mxu0 %v1637_v14 }
 0xaab   : > { %v4805_v15 = vpop.eup %4804 }
 0xaac   : > { %v1578_v16 = vmul.f32 %v4805_v15, %v4801_v23  ;;  %v1828_v23 = vld [vmem:[%s4966_s4] sm:$0xff] }
 0xaad   : > { %v4091_v59 = vcombine.high %v1828_v23, %v1836_v54  ;;  %v4090_v11 = vcombine.low %v1828_v23, %v1836_v54  ;;  %v1844_v15 = vld [vmem:[%s4966_s4 + $0x80] sm:$0xff] }
 0xaae   : > { %v1581_v17 = vpack.c.bf16 %v1578_v16, %v1578_v16  ;;  %v1852_v16 = vld [vmem:[%s4966_s4 + $0xc0] sm:$0xff] }
 0xaaf   : > { %v4807_v18 = vpop.eup %4806  ;;  %2107 = vmatprep.subr.bf16.mxu0 %v4091_v59  ;;  %v1842_v59 = vld [vmem:[%s4966_s4 + $0x70] sm:$0xff] }
 0xab0   : > { %v1580_v19 = vmul.f32 %v4807_v18, %v4803_v58  ;;  %4584 = vmatmul.mubr.msk.bf16.vlgmr.msra.gmra.mrb[28].mxu1 %vm802_vm5, %v1581_v17  ;;  %v1829_v58 = vld [vmem:[%s4966_s4 + $0x8] sm:$0xff]  ;;  %v4107_v18 = vcombine.high %v1844_v15, %v1852_v16 }
 0xab1   : > { %4597 = vmatprep.mubr.msk.bf16.mxu1 %vm4829_vm3, %v4828_v13  ;;  %4594 = vmatpush3.bf16.msra.mxu1 %v4646_v20  ;;  %v4092_v12 = vcombine.low %v1829_v58, %v1837_v10  ;;  %v4093_v14 = vcombine.high %v1829_v58, %v1837_v10  ;;  %v1845_v17 = vld [vmem:[%s4966_s4 + $0x88] sm:$0xff]  ;;  %v1834_v58 = vld [vmem:[%s4966_s4 + $0x30] sm:$0xff]  ;;  %v1835_v10 = vld [vmem:[%s4966_s4 + $0x38] sm:$0xff] }
 0xab2   : > { %v1582_v26 = vpack.c.bf16 %v1580_v19, %v1580_v19  ;;  %4595 = vmatprep.subr.bf16.mxu1 %v4828_v13  ;;  %v4637_v13 = vunpack.i.l.bf16 %v4636_v34  ;;  %v1853_v19 = vld [vmem:[%s4966_s4 + $0xc8] sm:$0xff] }
 0xab3   : > { %v4108_v20 = vcombine.low %v1845_v17, %v1853_v19 }
 0xab4   : > { %4590 = vmatmul.mubr.msk.bf16.vlgmr.msra.gmra.mrb[32].mxu0 %vm802_vm5, %v1582_v26  ;;  %v1706_v43 = vsel %vm1705_vm7, %v1703_v40, %v4637_v13  ;;  %v4106_v26 = vcombine.low %v1844_v15, %v1852_v16  ;;  %v4103_v15 = vcombine.high %v1834_v58, %v1842_v59 }
 0xab5   : > { %4596 = vmatpush3.bf16.msra.mxu1 %v4647_v21  ;;  %2108 = vmatpush1.bf16.msra.mxu0 %v4090_v11  ;;  %v4109_v21 = vcombine.high %v1845_v17, %v1853_v19  ;;  %v1843_v11 = vld [vmem:[%s4966_s4 + $0x78] sm:$0xff]  ;;  %v1850_v17 = vld [vmem:[%s4966_s4 + $0xb0] sm:$0xff] }
 0xab6   : > { %2150 = vmatprep.subr.bf16.mxu1 %v4093_v14  ;;  %2109 = vmatprep.subr.bf16.mxu0 %v4107_v18  ;;  %v4105_v16 = vcombine.high %v1835_v10, %v1843_v11  ;;  %v1858_v18 = vld [vmem:[%s4966_s4 + $0xf0] sm:$0xff]  ;;  %v1851_v19 = vld [vmem:[%s4966_s4 + $0xb8] sm:$0xff] }
 0xab9   : > { %2110 = vmatpush1.bf16.msra.mxu0 %v4106_v26  ;;  %v1859_v26 = vld [vmem:[%s4966_s4 + $0xf8] sm:$0xff] }
 0xb83   : > { %v1625_v22 = vpop.f32.mrb[28].mxu1 }
 0xb84   : > { %v4585_v24 = vpop.f32.mrb[29].mxu1 }
 0xb85   : > { %v1628_v25 = vpop.f32.mrb[30].mxu1  ;;  %v1838_v24 = vld [vmem:[%s4966_s4 + $0x50] sm:$0xff] }
 0xb86   : > { %v4586_v27 = vpop.f32.mrb[31].mxu1  ;;  %v1831_v25 = vld [vmem:[%s4966_s4 + $0x18] sm:$0xff] }
 0xb87   : > { %v1673_v28 = vpop.f32.mrb[32].mxu0  ;;  %v4844_v27 = vmov 0  }
 0xb88   : > { %v4639_v29 = vpack.i.bf16 %v1673_v28, %v1625_v22  ;;  %v4591_v30 = vpop.f32.mrb[33].mxu0  ;;  %v1830_v22 = vld [vmem:[%s4966_s4 + $0x10] sm:$0xff]  ;;  %2139 = vmatprep.mubr.bf16.mxu0 %v4844_v27 }
 0xb89   : > { %v1676_v31 = vpop.f32.mrb[34].mxu0  ;;  %v4095_v28 = vcombine.high %v1830_v22, %v1838_v24  ;;  %v4094_v30 = vcombine.low %v1830_v22, %v1838_v24  ;;  %v4119_v22 = vcombine.high %v1850_v17, %v1858_v18  ;;  %v4121_v24 = vcombine.high %v1851_v19, %v1859_v26 }
 0xb8a   : > { %4640 = vrot.lane.b32.xlu0 %v4639_v29, %s4843_s18  ;;  %v4592_v32 = vpop.f32.mrb[35].mxu0  ;;  %v1839_v29 = vld [vmem:[%s4966_s4 + $0x58] sm:$0xff] }
 0xb8b   : > { %v4096_v31 = vcombine.low %v1831_v25, %v1839_v29  ;;  %v4097_v32 = vcombine.high %v1831_v25, %v1839_v29  ;;  %2193 = vmatprep.subr.bf16.mxu0 %v4095_v28  ;;  %v4118_v25 = vcombine.low %v1850_v17, %v1858_v18  ;;  %v4120_v28 = vcombine.low %v1851_v19, %v1859_v26  ;;  %v4648_v29 = vld [vmem:[%s4981_s22 + $0x40] sm:$0xff]  }
 0xbfc   : > { %v4641_v38 = vpop.permute.xlu0 %4640 }
 0xbfd   : > { %v4643_v41 = vunpack.i.h.bf16 %v4641_v38  ;;  %v4642_v42 = vunpack.i.l.bf16 %v4641_v38 }
 0xbff   : > { %v1710_v45 = vsel %vm1708_vm8, %v1707_v44, %v4643_v41  ;;  %v1709_v46 = vsel %vm1708_vm8, %v1706_v43, %v4642_v42  ;;  %v4088_v41 = vld [vmem:[%s5537_s21] ss:$0 sm:$0xff] }
 0xc00   : > { %v1711_v47 = vpack.c.bf16 %v1710_v45, %v1709_v46  ;;  %v4089_v46 = vld [vmem:[%s5538_s30] ss:$0 sm:$0xff] }
 0xc02   : > { %4598 = vmatmul.mubr.msk.bf16.vlgmr.msra.gmra.mrb[32].mxu1 %vm752_vm4, %v1711_v47 }
 0xc03   : > { %2151 = vmatpush1.bf16.msra.mxu1 %v4092_v12  ;;  %2182 = vmatprep.mubr.bf16.mxu1 %v4844_v27 }
 0xc04   : > { %2152 = vmatprep.subr.bf16.mxu1 %v4109_v21  ;;  %v4104_v21 = vcombine.low %v1835_v10, %v1843_v11 }
 0xc07   : > { %2153 = vmatpush1.bf16.msra.mxu1 %v4108_v20  ;;  %v4102_v20 = vcombine.low %v1834_v58, %v1842_v59 }
 0xc08   : > { %2236 = vmatprep.subr.bf16.mxu1 %v4097_v32  ;;  %v4651_v32 = vld [vmem:[%s4981_s22 + $0x80] sm:$0xff]  }
 0xcd5   : > { %v1772_v49 = vpop.f32.mrb[32].mxu1 }
 0xcd6   : > { %v1773_v50 = vadd.f32 %v4084_v48, %v1772_v49  ;;  %v4599_v9 = vpop.f32.mrb[33].mxu1  ;;  %v1854_v49 = vld [vmem:[%s4966_s4 + $0xd0] sm:$0xff] }
 0xcd7   : > { %v1775_v51 = vpop.f32.mrb[34].mxu1  ;;  %v1855_v9 = vld [vmem:[%s4966_s4 + $0xd8] sm:$0xff] }
 0xcd8   : > { %v1776_v52 = vadd.f32 %v4084_v48, %v1775_v51  ;;  %v4600_v5 = vpop.f32.mrb[35].mxu1  ;;  %v1779_v55 = vadd.f32 %v4816_v53, %v1773_v50  ;;  %v1846_v48 = vld [vmem:[%s4966_s4 + $0x90] sm:$0xff]  ;;  %v1847_v50 = vld [vmem:[%s4966_s4 + $0x98] sm:$0xff] }
 0xcd9   : > { %v4111_v53 = vcombine.high %v1846_v48, %v1854_v49 }
 0xcda   : > { %v1783_v56 = vsel %vm752_vm4, %v1779_v55, 0.0  ;;  %v1780_v60 = vadd.f32 %v4817_v57, %v1776_v52  ;;  %v1840_v57 = vld [vmem:[%s4966_s4 + $0x60] sm:$0xff] }
 0xcdb   : > { %1784 = vadd.xlane.f32.xlu1 %v1783_v56  ;;  %v1832_v56 = vld [vmem:[%s4966_s4 + $0x20] sm:$0xff] }
 0xcdc   : > { %v1786_v61 = vsel %vm752_vm4, %v1780_v60, 0.0 }
 0xcdd   : > { %1787 = vadd.xlane.f32.xlu0 %v1786_v61  ;;  %v1841_v61 = vld [vmem:[%s4966_s4 + $0x68] sm:$0xff] }
 0xd68   : > { %v1785_v62 = vpop.xlane.xlu1 %1784 }
 0xd69   : > { %v1789_v63 = vmul.f32 0.03125, %v1785_v62  ;;  %v4110_v62 = vcombine.low %v1846_v48, %v1854_v49  ;;  %v4669_v48 = vld [vmem:[%s4981_s22 + $0xe8] sm:$0xff]  }
 0xd6a   : > { %v1788_v0 = vpop.xlane.xlu0 %1787  ;;  %v4670_v49 = vld [vmem:[%s4981_s22 + $0x28] sm:$0xff]  }
 0xd6b   : > { %v1791_v1 = vsub.f32 %v1779_v55, %v1789_v63  ;;  %v1790_v2 = vmul.f32 0.03125, %v1788_v0  ;;  %v4113_v55 = vcombine.high %v1847_v50, %v1855_v9  ;;  %v4112_v63 = vcombine.low %v1847_v50, %v1855_v9  ;;  %v4671_v50 = vld [vmem:[%s4981_s22 + $0xa8] sm:$0xff]   ;;  %v4672_v9 = vld [vmem:[%s4981_s22 + $0x70] sm:$0xff]  }
 0xd6c   : > { %v4099_v0 = vcombine.high %v1832_v56, %v1840_v57 }
 0xd6d   : > { %v1792_v3 = vsub.f32 %v1780_v60, %v1790_v2  ;;  %v1793_v4 = vmul.f32 %v1791_v1, %v1791_v1  ;;  %v1833_v60 = vld [vmem:[%s4966_s4 + $0x28] sm:$0xff]  ;;  %v1848_v2 = vld [vmem:[%s4966_s4 + $0xa0] sm:$0xff] }
 0xd6f   : > { %v1795_v6 = vsel %vm752_vm4, %v1793_v4, 0.0  ;;  %v1794_v7 = vmul.f32 %v1792_v3, %v1792_v3  ;;  %v1849_v4 = vld [vmem:[%s4966_s4 + $0xa8] sm:$0xff] }
 0xd70   : > { %1796 = vadd.xlane.f32.xlu0 %v1795_v6  ;;  %v1857_v6 = vld [vmem:[%s4966_s4 + $0xe8] sm:$0xff] }
 0xd71   : > { %v1798_v8 = vsel %vm752_vm4, %v1794_v7, 0.0  ;;  %v4098_v7 = vcombine.low %v1832_v56, %v1840_v57  ;;  %v4117_v54 = vcombine.high %v1849_v4, %v1857_v6  ;;  %v4116_v14 = vcombine.low %v1849_v4, %v1857_v6  ;;  %v4676_v56 = vld [vmem:[%s4981_s22 + $0x78] sm:$0xff]  }
 0xd72   : > { %1799 = vadd.xlane.f32.xlu1 %v1798_v8  ;;  %v4100_v8 = vcombine.low %v1833_v60, %v1841_v61  ;;  %v4677_v57 = vld [vmem:[%s4981_s22 + $0xf8] sm:$0xff]  }
 0xdfd   : > { %v1797_v33 = vpop.xlane.xlu0 %1796 }
 0xdfe   : > { %v1801_v34 = vmul.f32 0.03125, %v1797_v33  ;;  %v4652_v33 = vld [vmem:[%s4981_s22 + $0x48] sm:$0xff]  }
 0xdff   : > { %v1800_v35 = vpop.xlane.xlu1 %1799 }
 0xe00   : > { %v1803_v36 = vmax.f32 %v1801_v34, 0.0  ;;  %v1802_v37 = vmul.f32 0.03125, %v1800_v35  ;;  %v4653_v34 = vld [vmem:[%s4981_s22 + $0xc8] sm:$0xff]  }
 0xe01   : > { %v4655_v35 = vld [vmem:[%s4981_s22 + $0x88] sm:$0xff]  }
 0xe02   : > { %v1805_v13 = vadd.f32 1e-05, %v1803_v36  ;;  %v1804_v38 = vmax.f32 %v1802_v37, 0.0  ;;  %v4656_v36 = vld [vmem:[%s4981_s22 + $0x50] sm:$0xff]  }
 0xe03   : > { %v4657_v37 = vld [vmem:[%s4981_s22 + $0xd0] sm:$0xff]  }
 0xe04   : > { %4808 = vrsqrt.f32 %v1805_v13  ;;  %v1806_v39 = vadd.f32 1e-05, %v1804_v38  ;;  %v4658_v13 = vld [vmem:[%s4981_s22 + $0x10] sm:$0xff]  }
 0xe05   : > { %v4659_v38 = vld [vmem:[%s4981_s22 + $0x90] sm:$0xff]  }
 0xe06   : > { %4810 = vrsqrt.f32 %v1806_v39  ;;  %v4660_v39 = vld [vmem:[%s4981_s22 + $0x58] sm:$0xff]  }
 0xe0e   : > { %v4809_v40 = vpop.eup %4808 }
 0xe0f   : > { %v1809_v42 = vmul.f32 %v4809_v40, %v1791_v1  ;;  %v4101_v1 = vcombine.high %v1833_v60, %v1841_v61  ;;  %v4661_v40 = vld [vmem:[%s4981_s22 + $0xd8] sm:$0xff]  }
 0xe10   : > { %v4811_v43 = vpop.eup %4810  ;;  %v4678_v60 = vld [vmem:[%s4981_s22 + $0x38] sm:$0xff]  }
 0xe11   : > { %v1817_v44 = vmul.f32 %v4088_v41, %v1809_v42  ;;  %v1810_v45 = vmul.f32 %v4811_v43, %v1792_v3  ;;  %v1856_v3 = vld [vmem:[%s4966_s4 + $0xe0] sm:$0xff]  ;;  %v4663_v42 = vld [vmem:[%s4981_s22 + $0x98] sm:$0xff]  }
 0xe12   : > { %v4115_v23 = vcombine.high %v1848_v2, %v1856_v3  ;;  %v4114_v12 = vcombine.low %v1848_v2, %v1856_v3  ;;  %v4664_v43 = vld [vmem:[%s4981_s22 + $0x60] sm:$0xff]   ;;  %v4679_v61 = vld [vmem:[%s4981_s22 + $0xb8] sm:$0xff]   ;;  %v5302_v3 = vld [vmem:[%s4971_s5 + $0x8] sm:$0xff] }
 0xe13   : > { %v1818_v47 = vmul.f32 %v4088_v41, %v1810_v45  ;;  %v5218_v51 = vadd.f32 %v4089_v46, %v1817_v44  ;;  %v4662_v41 = vld [vmem:[%s4981_s22 + $0x18] sm:$0xff]   ;;  %v4665_v44 = vld [vmem:[%s4981_s22 + $0xe0] sm:$0xff]  }
 0xe14   : > { %v4666_v45 = vld [vmem:[%s4981_s22 + $0x20] sm:$0xff]  }
 0xe15   : > { %v5220_v52 = vadd.f32 %v4089_v46, %v1818_v47  ;;  %v4667_v46 = vld [vmem:[%s4981_s22 + $0xa0] sm:$0xff]   ;;  %v4668_v47 = vld [vmem:[%s4981_s22 + $0x68] sm:$0xff]  }
 0xe17   : > { %v5224_v5 = vpack.c.bf16 %v5220_v52, %v5218_v51 }
 0xe19   : > { %4122 = vmatmul.mubr.msk.bf16.vlgmr.msra.gmra.mrb[36].mxu0 %vm752_vm4, %v5224_v5  ;;  %4123 = vmatmul.mubr.msk.bf16.vlgmr.msra.gmra.mrb[36].mxu1 %vm752_vm4, %v5224_v5 }
 0xe1a   : > { %2194 = vmatpush1.bf16.msra.mxu0 %v4094_v30  ;;  %2237 = vmatpush1.bf16.msra.mxu1 %v4096_v31  ;;  %v4649_v30 = vld [vmem:[%s4981_s22 + $0xc0] sm:$0xff]  }
 0xe1b   : > { %2195 = vmatprep.subr.bf16.mxu0 %v4111_v53  ;;  %2238 = vmatprep.subr.bf16.mxu1 %v4113_v55  ;;  %v4650_v31 = vld [vmem:[%s4981_s22] sm:$0xff]   ;;  %v4674_v53 = vld [vmem:[%s4981_s22 + $0x30] sm:$0xff]  }
 0xe1c   : > { %2225 = vmatprep.mubr.bf16.mxu0 %v4844_v27  ;;  %2268 = vmatprep.mubr.bf16.mxu1 %v4844_v27  ;;  %v4675_v55 = vld [vmem:[%s4981_s22 + $0xb0] sm:$0xff]  }
 0xe1e   : > { %2196 = vmatpush1.bf16.msra.mxu0 %v4110_v62  ;;  %2239 = vmatpush1.bf16.msra.mxu1 %v4112_v63  ;;  %v4680_v62 = vld [vmem:[%s4981_s22 + $0x140] sm:$0xff]  }
 0xe1f   : > { %2279 = vmatprep.subr.bf16.mxu0 %v4099_v0  ;;  %2322 = vmatprep.subr.bf16.mxu1 %v4101_v1  ;;  %v4681_v63 = vld [vmem:[%s4981_s22 + $0x1c0] sm:$0xff]   ;;  %v1864_v0 = vlaneseq }
 0xe21   : > { %4124 = vmatmul.mubr.msk.bf16.vlgmr.msra.gmra.mrb[40].mxu0 %vm752_vm4, %v5224_v5  ;;  %4125 = vmatmul.mubr.msk.bf16.vlgmr.msra.gmra.mrb[40].mxu1 %vm752_vm4, %v5224_v5  ;;  %v5298_v1 = vshrl.u32 %v1864_v0, 7 }
 0xe22   : > { %2280 = vmatpush1.bf16.msra.mxu0 %v4098_v7  ;;  %2323 = vmatpush1.bf16.msra.mxu1 %v4100_v8  ;;  %v1860_v8 = vld [vmem:[%s4971_s5] sm:$0xff] }
 0xe23   : > { %2281 = vmatprep.subr.bf16.mxu0 %v4115_v23  ;;  %2324 = vmatprep.subr.bf16.mxu1 %v4117_v54  ;;  %v1890_v2 = vsub.s32 6, %v5298_v1  ;;  %v1866_v6 = vsub.s32 0, %v5298_v1  ;;  %v1874_v7 = vsub.s32 2, %v5298_v1  ;;  %v1870_v23 = vsub.s32 1, %v5298_v1 }
 0xe24   : > { %2311 = vmatprep.mubr.bf16.mxu0 %v4844_v27  ;;  %2354 = vmatprep.mubr.bf16.mxu1 %v4844_v27  ;;  %v1878_v54 = vsub.s32 3, %v5298_v1  ;;  %v1894_v17 = vsub.s32 7, %v5298_v1 }
 0xe25   : > { %v5305_v4 = vrot.slane %v5302_v3, %v1890_v2  ;;  %v1867_v58 = vrot.slane %v1860_v8, %v1866_v6  ;;  %v1875_v59 = vrot.slane %v1860_v8, %v1874_v7  ;;  %v1871_v10 = vrot.slane %v1860_v8, %v1870_v23 }
 0xe26   : > { %2282 = vmatpush1.bf16.msra.mxu0 %v4114_v12  ;;  %2325 = vmatpush1.bf16.msra.mxu1 %v4116_v14  ;;  %v1879_v11 = vrot.slane %v1860_v8, %v1878_v54  ;;  %v1882_v12 = vsub.s32 4, %v5298_v1 }
 0xe27   : > { %2365 = vmatprep.subr.bf16.mxu0 %v4103_v15  ;;  %2408 = vmatprep.subr.bf16.mxu1 %v4105_v16  ;;  %v1886_v16 = vsub.s32 5, %v5298_v1 }
 0xe29   : > { %4126 = vmatmul.mubr.msk.bf16.vlgmr.msra.gmra.mrb[44].mxu0 %vm752_vm4, %v5224_v5  ;;  %4127 = vmatmul.mubr.msk.bf16.vlgmr.msra.gmra.mrb[44].mxu1 %vm752_vm4, %v5224_v5 }
 0xe2a   : > { %2366 = vmatpush1.bf16.msra.mxu0 %v4102_v20  ;;  %2409 = vmatpush1.bf16.msra.mxu1 %v4104_v21 }
 0xe2b   : > { %2367 = vmatprep.subr.bf16.mxu0 %v4119_v22  ;;  %2410 = vmatprep.subr.bf16.mxu1 %v4121_v24 }
 0xe2c   : > { %2397 = vmatprep.mubr.bf16.mxu0 %v4844_v27  ;;  %2440 = vmatprep.mubr.bf16.mxu1 %v4844_v27  ;;  %v4654_v27 = vld [vmem:[%s4981_s22 + $0x8] sm:$0xff]  }
 0xe2e   : > { %2368 = vmatpush1.bf16.msra.mxu0 %v4118_v25  ;;  %2411 = vmatpush1.bf16.msra.mxu1 %v4120_v28 }
 0xe2f   : > { %4307 = vmatprep.subr.bf16.mxu0 %v4648_v29  ;;  %4329 = vmatprep.subr.bf16.mxu1 %v4649_v30 }
 0xe31   : > { %4128 = vmatmul.mubr.msk.bf16.vlgmr.msra.gmra.mrb[48].mxu0 %vm752_vm4, %v5224_v5  ;;  %4129 = vmatmul.mubr.msk.bf16.vlgmr.msra.gmra.mrb[48].mxu1 %vm752_vm4, %v5224_v5  ;;  %v4673_v5 = vld [vmem:[%s4981_s22 + $0xf0] sm:$0xff]  }
 0xe32   : > { %4308 = vmatpush3.bf16.msra.mxu0 %v4650_v31  ;;  %4330 = vmatpush3.bf16.msra.mxu1 %v4651_v32  ;;  %v1883_v32 = vrot.slane %v1860_v8, %v1882_v12 }
 0xe33   : > { %4309 = vmatprep.subr.bf16.mxu0 %v4652_v33  ;;  %4331 = vmatprep.subr.bf16.mxu1 %v4653_v34  ;;  %v1891_v33 = vrot.slane %v1860_v8, %v1890_v2 }
 0xe36   : > { %4310 = vmatpush3.bf16.msra.mxu0 %v4654_v27  ;;  %4332 = vmatpush3.bf16.msra.mxu1 %v4655_v35  ;;  %v1887_v35 = vrot.slane %v1860_v8, %v1886_v16 }
 0xe37   : > { %4311 = vmatprep.subr.bf16.mxu0 %v4656_v36  ;;  %4333 = vmatprep.subr.bf16.mxu1 %v4657_v37  ;;  %v1895_v36 = vrot.slane %v1860_v8, %v1894_v17  ;;  %v1907_v8 = vrot.slane %v5302_v3, %v1874_v7  ;;  %v1911_v7 = vrot.slane %v5302_v3, %v1878_v54 }
 0xe3a   : > { %4312 = vmatpush3.bf16.msra.mxu0 %v4658_v13  ;;  %4334 = vmatpush3.bf16.msra.mxu1 %v4659_v38 }
 0xe3b   : > { %4313 = vmatprep.subr.bf16.mxu0 %v4660_v39  ;;  %4335 = vmatprep.subr.bf16.mxu1 %v4661_v40 }
 0xe3e   : > { %4314 = vmatpush3.bf16.msra.mxu0 %v4662_v41  ;;  %4336 = vmatpush3.bf16.msra.mxu1 %v4663_v42 }
 0xe3f   : > { %4315 = vmatprep.subr.bf16.mxu0 %v4664_v43  ;;  %4337 = vmatprep.subr.bf16.mxu1 %v4665_v44 }
 0xe42   : > { %4316 = vmatpush3.bf16.msra.mxu0 %v4666_v45  ;;  %4338 = vmatpush3.bf16.msra.mxu1 %v4667_v46 }
 0xe43   : > { %4317 = vmatprep.subr.bf16.mxu0 %v4668_v47  ;;  %4339 = vmatprep.subr.bf16.mxu1 %v4669_v48 }
 0xe46   : > { %4318 = vmatpush3.bf16.msra.mxu0 %v4670_v49  ;;  %4340 = vmatpush3.bf16.msra.mxu1 %v4671_v50  ;;  %v4682_v50 = vld [vmem:[%s4981_s22 + $0x100] sm:$0xff]  }
 0xe47   : > { %4319 = vmatprep.subr.bf16.mxu0 %v4672_v9  ;;  %4341 = vmatprep.subr.bf16.mxu1 %v4673_v5  ;;  %v4683_v9 = vld [vmem:[%s4981_s22 + $0x180] sm:$0xff]  }
 0xe4a   : > { %4320 = vmatpush3.bf16.msra.mxu0 %v4674_v53  ;;  %4342 = vmatpush3.bf16.msra.mxu1 %v4675_v55 }
 0xe4b   : > { %4321 = vmatprep.subr.bf16.mxu0 %v4676_v56  ;;  %4343 = vmatprep.subr.bf16.mxu1 %v4677_v57  ;;  %v4684_v57 = vld [vmem:[%s4981_s22 + $0x148] sm:$0xff]  }
 0xe4e   : > { %4322 = vmatpush3.bf16.msra.mxu0 %v4678_v60  ;;  %4344 = vmatpush3.bf16.msra.mxu1 %v4679_v61  ;;  %v4685_v60 = vld [vmem:[%s4981_s22 + $0x1c8] sm:$0xff]   ;;  %v1899_v61 = vrot.slane %v5302_v3, %v1866_v6  ;;  %v1903_v6 = vrot.slane %v5302_v3, %v1870_v23  ;;  %v4689_v23 = vld [vmem:[%s4981_s22 + $0x1d0] sm:$0xff]  }
 0xe4f   : > { %4351 = vmatprep.subr.bf16.mxu0 %v4680_v62  ;;  %4373 = vmatprep.subr.bf16.mxu1 %v4681_v63 }
 0xeec   : > { %v2141_v14 = vpop.f32.mrb[36].mxu0  ;;  %v2184_v15 = vpop.f32.mrb[36].mxu1 }
 0xeed   : > { %v2142_v18 = vadd.f32 %v2141_v14, %v1867_v58  ;;  %v2185_v19 = vadd.f32 %v2184_v15, %v1875_v59  ;;  %v2143_v26 = vpop.f32.mrb[37].mxu0  ;;  %v2186_v20 = vpop.f32.mrb[37].mxu1 }
 0xeee   : > { %v2144_v21 = vadd.f32 %v2143_v26, %v1871_v10  ;;  %v2187_v22 = vadd.f32 %v2186_v20, %v1879_v11  ;;  %v2145_v24 = vpop.f32.mrb[38].mxu0  ;;  %v2188_v25 = vpop.f32.mrb[38].mxu1 }
 0xeef   : > { %v2146_v28 = vadd.f32 %v2145_v24, %v1867_v58  ;;  %v2189_v29 = vadd.f32 %v2188_v25, %v1875_v59  ;;  %v2147_v30 = vpop.f32.mrb[39].mxu0  ;;  %v2190_v31 = vpop.f32.mrb[39].mxu1  ;;  %v2451_v37 = vmax.f32 %v2142_v18, 0.0  ;;  %v2453_v13 = vmax.f32 %v2185_v19, 0.0  ;;  %v4686_v18 = vld [vmem:[%s4981_s22 + $0x108] sm:$0xff]   ;;  %v4688_v24 = vld [vmem:[%s4981_s22 + $0x150] sm:$0xff]  }
 0xef0   : > { %v2148_v34 = vadd.f32 %v2147_v30, %v1871_v10  ;;  %v2191_v27 = vadd.f32 %v2190_v31, %v1879_v11  ;;  %v2452_v40 = vmax.f32 %v2144_v21, 0.0  ;;  %v2454_v41 = vmax.f32 %v2187_v22, 0.0  ;;  %v4687_v19 = vld [vmem:[%s4981_s22 + $0x188] sm:$0xff]  }
 0xef1   : > { %v2467_v38 = vmax.f32 %v2146_v28, 0.0  ;;  %v2469_v39 = vmax.f32 %v2189_v29, 0.0 }
 0xef2   : > { %v2468_v42 = vmax.f32 %v2148_v34, 0.0  ;;  %v2470_v43 = vmax.f32 %v2191_v27, 0.0 }
 0xef3   : > { %v2483_v44 = vpack.c.bf16 %v2467_v38, %v2451_v37  ;;  %v2485_v45 = vpack.c.bf16 %v2469_v39, %v2453_v13 }
 0xef4   : > { %v2484_v46 = vpack.c.bf16 %v2468_v42, %v2452_v40  ;;  %v2486_v47 = vpack.c.bf16 %v2470_v43, %v2454_v41  ;;  %v2227_v48 = vpop.f32.mrb[40].mxu0  ;;  %v2270_v49 = vpop.f32.mrb[40].mxu1  ;;  %v4692_v40 = vld [vmem:[%s4981_s22 + $0x158] sm:$0xff]  }
 0xef5   : > { %v2228_v5 = vadd.f32 %v2227_v48, %v1883_v32  ;;  %v2271_v53 = vadd.f32 %v2270_v49, %v1891_v33  ;;  %v2229_v55 = vpop.f32.mrb[41].mxu0  ;;  %v2272_v56 = vpop.f32.mrb[41].mxu1  ;;  %v4693_v41 = vld [vmem:[%s4981_s22 + $0x1d8] sm:$0xff]  }
 0xef6   : > { %v2230_v62 = vadd.f32 %v2229_v55, %v1887_v35  ;;  %v2273_v63 = vadd.f32 %v2272_v56, %v1895_v36  ;;  %v2231_v0 = vpop.f32.mrb[42].mxu0  ;;  %v2274_v2 = vpop.f32.mrb[42].mxu1  ;;  %3562 = vmatprep.mubr.bf16.mxu0 %v2484_v46  ;;  %3603 = vmatprep.mubr.bf16.mxu1 %v2486_v47  ;;  %v4694_v55 = vld [vmem:[%s4981_s22 + $0x118] sm:$0xff]  }
 0xef7   : > { %v2232_v58 = vadd.f32 %v2231_v0, %v1883_v32  ;;  %v2275_v59 = vadd.f32 %v2274_v2, %v1891_v33  ;;  %v2233_v10 = vpop.f32.mrb[43].mxu0  ;;  %v2276_v11 = vpop.f32.mrb[43].mxu1  ;;  %3563 = vmatmul.mubr.bf16.vlgmr.msra.gmra.mrb[52].mxu0 %v2483_v44  ;;  %3604 = vmatmul.mubr.bf16.vlgmr.msra.gmra.mrb[52].mxu1 %v2485_v45  ;;  %v2455_v26 = vmax.f32 %v2228_v5, 0.0  ;;  %v2457_v20 = vmax.f32 %v2271_v53, 0.0  ;;  %v4695_v56 = vld [vmem:[%s4981_s22 + $0x198] sm:$0xff]  }
 0xef8   : > { %v2234_v14 = vadd.f32 %v2233_v10, %v1887_v35  ;;  %v2277_v15 = vadd.f32 %v2276_v11, %v1895_v36  ;;  %4352 = vmatpush3.bf16.msra.mxu0 %v4682_v50  ;;  %4374 = vmatpush3.bf16.msra.mxu1 %v4683_v9  ;;  %v2456_v25 = vmax.f32 %v2230_v62, 0.0  ;;  %v2458_v28 = vmax.f32 %v2273_v63, 0.0  ;;  %v4690_v35 = vld [vmem:[%s4981_s22 + $0x110] sm:$0xff]  }
 0xef9   : > { %v2471_v21 = vmax.f32 %v2232_v58, 0.0  ;;  %v2473_v22 = vmax.f32 %v2275_v59, 0.0  ;;  %4353 = vmatprep.subr.bf16.mxu0 %v4684_v57  ;;  %4375 = vmatprep.subr.bf16.mxu1 %v4685_v60  ;;  %v4691_v36 = vld [vmem:[%s4981_s22 + $0x190] sm:$0xff]   ;;  %v1915_v50 = vrot.slane %v5302_v3, %v1882_v12  ;;  %v1919_v9 = vrot.slane %v5302_v3, %v1886_v16  ;;  %v4696_v12 = vld [vmem:[%s4981_s22 + $0x160] sm:$0xff]  }
 0xefa   : > { %v2472_v29 = vmax.f32 %v2234_v14, 0.0  ;;  %v2474_v30 = vmax.f32 %v2277_v15, 0.0  ;;  %v1927_v57 = vrot.slane %v5302_v3, %v1894_v17  ;;  %v4697_v16 = vld [vmem:[%s4981_s22 + $0x1e0] sm:$0xff]  }
 0xefb   : > { %v5341_v31 = vpack.c.bf16 %v2471_v21, %v2455_v26  ;;  %v5343_v32 = vpack.c.bf16 %v2473_v22, %v2457_v20  ;;  %v4699_v14 = vld [vmem:[%s4981_s22 + $0x1a0] sm:$0xff]   ;;  %v4700_v26 = vld [vmem:[%s4981_s22 + $0x168] sm:$0xff]  }
 0xefc   : > { %v2488_v54 = vpack.c.bf16 %v2472_v29, %v2456_v25  ;;  %v2490_v33 = vpack.c.bf16 %v2474_v30, %v2458_v28  ;;  %4354 = vmatpush3.bf16.msra.mxu0 %v4686_v18  ;;  %4376 = vmatpush3.bf16.msra.mxu1 %v4687_v19  ;;  %v2313_v34 = vpop.f32.mrb[44].mxu0  ;;  %v2356_v27 = vpop.f32.mrb[44].mxu1  ;;  %v4701_v20 = vld [vmem:[%s4981_s22 + $0x1e8] sm:$0xff]  }
 0xefd   : > { %v2314_v37 = vadd.f32 %v2313_v34, %v1899_v61  ;;  %v2357_v13 = vadd.f32 %v2356_v27, %v1907_v8  ;;  %v2315_v38 = vpop.f32.mrb[45].mxu0  ;;  %v2358_v39 = vpop.f32.mrb[45].mxu1  ;;  %4355 = vmatprep.subr.bf16.mxu0 %v4688_v24  ;;  %4377 = vmatprep.subr.bf16.mxu1 %v4689_v23  ;;  %v4702_v34 = vld [vmem:[%s4981_s22 + $0x128] sm:$0xff]  }
 0xefe   : > { %v2316_v42 = vadd.f32 %v2315_v38, %v1903_v6  ;;  %v2359_v43 = vadd.f32 %v2358_v39, %v1911_v7  ;;  %v2317_v44 = vpop.f32.mrb[46].mxu0  ;;  %v2360_v45 = vpop.f32.mrb[46].mxu1  ;;  %3644 = vmatprep.mubr.bf16.mxu0 %v2488_v54  ;;  %3685 = vmatprep.mubr.bf16.mxu1 %v2490_v33  ;;  %v4703_v27 = vld [vmem:[%s4981_s22 + $0x1a8] sm:$0xff]   ;;  %v4704_v38 = vld [vmem:[%s4981_s22 + $0x170] sm:$0xff]  }
 0xeff   : > { %v2318_v46 = vadd.f32 %v2317_v44, %v1899_v61  ;;  %v2361_v47 = vadd.f32 %v2360_v45, %v1907_v8  ;;  %v2319_v48 = vpop.f32.mrb[47].mxu0  ;;  %v2362_v49 = vpop.f32.mrb[47].mxu1  ;;  %v2459_v60 = vmax.f32 %v2314_v37, 0.0  ;;  %v2461_v61 = vmax.f32 %v2357_v13, 0.0 }
 0xf00   : > { %v2320_v5 = vadd.f32 %v2319_v48, %v1903_v6  ;;  %v2363_v53 = vadd.f32 %v2362_v49, %v1911_v7  ;;  %4356 = vmatpush3.bf16.msra.mxu0 %v4690_v35  ;;  %4378 = vmatpush3.bf16.msra.mxu1 %v4691_v36  ;;  %v2460_v0 = vmax.f32 %v2316_v42, 0.0  ;;  %v2462_v2 = vmax.f32 %v2359_v43, 0.0  ;;  %v4698_v6 = vld [vmem:[%s4981_s22 + $0x120] sm:$0xff]   ;;  %v4707_v48 = vld [vmem:[%s4981_s22 + $0x1b0] sm:$0xff]   ;;  %v4708_v49 = vld [vmem:[%s4981_s22 + $0x178] sm:$0xff]  }
 0xf01   : > { %v2475_v62 = vmax.f32 %v2318_v46, 0.0  ;;  %v2477_v63 = vmax.f32 %v2361_v47, 0.0  ;;  %4357 = vmatprep.subr.bf16.mxu0 %v4692_v40  ;;  %4379 = vmatprep.subr.bf16.mxu1 %v4693_v41  ;;  %v4706_v47 = vld [vmem:[%s4981_s22 + $0x130] sm:$0xff]  }
 0xf02   : > { %v2476_v8 = vmax.f32 %v2320_v5, 0.0  ;;  %v2478_v58 = vmax.f32 %v2363_v53, 0.0  ;;  %v4711_v5 = vld [vmem:[%s4981_s22 + $0x1b8] sm:$0xff]   ;;  %v4712_v53 = vld [vmem:[%s4981_s22 + $0x240] sm:$0xff]  }
 0xf03   : > { %v5362_v59 = vpack.c.bf16 %v2475_v62, %v2459_v60  ;;  %v5364_v1 = vpack.c.bf16 %v2477_v63, %v2461_v61  ;;  %v4716_v60 = vld [vmem:[%s4981_s22 + $0x248] sm:$0xff]  }
 0xf04   : > { %v5366_v3 = vpack.c.bf16 %v2476_v8, %v2460_v0  ;;  %v5368_v17 = vpack.c.bf16 %v2478_v58, %v2462_v2  ;;  %4358 = vmatpush3.bf16.msra.mxu0 %v4694_v55  ;;  %4380 = vmatpush3.bf16.msra.mxu1 %v4695_v56  ;;  %v2399_v10 = vpop.f32.mrb[48].mxu0  ;;  %v2442_v11 = vpop.f32.mrb[48].mxu1  ;;  %v4713_v55 = vld [vmem:[%s4981_s22 + $0x2c0] sm:$0xff]   ;;  %v4717_v61 = vld [vmem:[%s4981_s22 + $0x2c8] sm:$0xff]   ;;  %v4724_v0 = vld [vmem:[%s4981_s22 + $0x258] sm:$0xff]  }
 0xf05   : > { %v2400_v15 = vadd.f32 %v2399_v10, %v1915_v50  ;;  %v2443_v18 = vadd.f32 %v2442_v11, %v5305_v4  ;;  %v2401_v19 = vpop.f32.mrb[49].mxu0  ;;  %v2444_v7 = vpop.f32.mrb[49].mxu1  ;;  %4359 = vmatprep.subr.bf16.mxu0 %v4696_v12  ;;  %4381 = vmatprep.subr.bf16.mxu1 %v4697_v16  ;;  %v4714_v56 = vld [vmem:[%s4981_s22 + $0x200] sm:$0xff]   ;;  %v4718_v62 = vld [vmem:[%s4981_s22 + $0x208] sm:$0xff]   ;;  %v4720_v12 = vld [vmem:[%s4981_s22 + $0x250] sm:$0xff]  }
 0xf06   : > { %v2402_v21 = vadd.f32 %v2401_v19, %v1919_v9  ;;  %v2445_v22 = vadd.f32 %v2444_v7, %v1927_v57  ;;  %v2403_v24 = vpop.f32.mrb[50].mxu0  ;;  %v2446_v23 = vpop.f32.mrb[50].mxu1  ;;  %v4719_v63 = vld [vmem:[%s4981_s22 + $0x288] sm:$0xff]   ;;  %v4723_v16 = vld [vmem:[%s4981_s22 + $0x290] sm:$0xff]   ;;  %v4725_v2 = vld [vmem:[%s4981_s22 + $0x2d8] sm:$0xff]  }
 0xf07   : > { %v2404_v25 = vadd.f32 %v2403_v24, %v1915_v50  ;;  %v2447_v28 = vadd.f32 %v2446_v23, %v5305_v4  ;;  %v2405_v29 = vpop.f32.mrb[51].mxu0  ;;  %v2448_v30 = vpop.f32.mrb[51].mxu1  ;;  %v2463_v35 = vmax.f32 %v2400_v15, 0.0  ;;  %v2465_v36 = vmax.f32 %v2443_v18, 0.0  ;;  %v4705_v4 = vld [vmem:[%s4981_s22 + $0x1f0] sm:$0xff]   ;;  %v4709_v50 = vld [vmem:[%s4981_s22 + $0x1f8] sm:$0xff]  }
 0xf08   : > { %v2406_v54 = vadd.f32 %v2405_v29, %v1919_v9  ;;  %v2449_v33 = vadd.f32 %v2448_v30, %v1927_v57  ;;  %4360 = vmatpush3.bf16.msra.mxu0 %v4698_v6  ;;  %4382 = vmatpush3.bf16.msra.mxu1 %v4699_v14  ;;  %v2464_v39 = vmax.f32 %v2402_v21, 0.0  ;;  %v2466_v40 = vmax.f32 %v2445_v22, 0.0  ;;  %v4710_v9 = vld [vmem:[%s4981_s22 + $0x138] sm:$0xff]   ;;  %v4715_v57 = vld [vmem:[%s4981_s22 + $0x280] sm:$0xff]   ;;  %v4732_v6 = vld [vmem:[%s4981_s22 + $0x268] sm:$0xff]  }
 0xf09   : > { %v2479_v37 = vmax.f32 %v2404_v25, 0.0  ;;  %v2481_v13 = vmax.f32 %v2447_v28, 0.0  ;;  %4361 = vmatprep.subr.bf16.mxu0 %v4700_v26  ;;  %4383 = vmatprep.subr.bf16.mxu1 %v4701_v20  ;;  %v4726_v8 = vld [vmem:[%s4981_s22 + $0x218] sm:$0xff]   ;;  %v4730_v10 = vld [vmem:[%s4981_s22 + $0x220] sm:$0xff]   ;;  %v4733_v14 = vld [vmem:[%s4981_s22 + $0x2e8] sm:$0xff]  }
 0xf0a   : > { %v2480_v41 = vmax.f32 %v2406_v54, 0.0  ;;  %v2482_v42 = vmax.f32 %v2449_v33, 0.0  ;;  %v4727_v58 = vld [vmem:[%s4981_s22 + $0x298] sm:$0xff]   ;;  %v4731_v11 = vld [vmem:[%s4981_s22 + $0x2a0] sm:$0xff]   ;;  %v4734_v15 = vld [vmem:[%s4981_s22 + $0x228] sm:$0xff]  }
 0xf0b   : > { %v5380_v43 = vpack.c.bf16 %v2479_v37, %v2463_v35  ;;  %v5382_v44 = vpack.c.bf16 %v2481_v13, %v2465_v36  ;;  %v4735_v18 = vld [vmem:[%s4981_s22 + $0x2a8] sm:$0xff]   ;;  %v4736_v19 = vld [vmem:[%s4981_s22 + $0x270] sm:$0xff]   ;;  %v4740_v21 = vld [vmem:[%s4981_s22 + $0x278] sm:$0xff]  }
 0xf0c   : > { %v5384_v45 = vpack.c.bf16 %v2480_v41, %v2464_v39  ;;  %v5386_v46 = vpack.c.bf16 %v2482_v42, %v2466_v40  ;;  %4362 = vmatpush3.bf16.msra.mxu0 %v4702_v34  ;;  %4384 = vmatpush3.bf16.msra.mxu1 %v4703_v27  ;;  %v4737_v7 = vld [vmem:[%s4981_s22 + $0x2f0] sm:$0xff]   ;;  %v4741_v22 = vld [vmem:[%s4981_s22 + $0x2f8] sm:$0xff]   ;;  %v4744_v25 = vld [vmem:[%s4981_s22 + $0x340] sm:$0xff]  }
 0xf0d   : > { %4363 = vmatprep.subr.bf16.mxu0 %v4704_v38  ;;  %4385 = vmatprep.subr.bf16.mxu1 %v4705_v4  ;;  %v4738_v26 = vld [vmem:[%s4981_s22 + $0x230] sm:$0xff]   ;;  %v4742_v24 = vld [vmem:[%s4981_s22 + $0x238] sm:$0xff]   ;;  %v4745_v28 = vld [vmem:[%s4981_s22 + $0x3c0] sm:$0xff]  }
 0xf0e   : > { %v4739_v20 = vld [vmem:[%s4981_s22 + $0x2b0] sm:$0xff]   ;;  %v4743_v23 = vld [vmem:[%s4981_s22 + $0x2b8] sm:$0xff]   ;;  %v4746_v29 = vld [vmem:[%s4981_s22 + $0x300] sm:$0xff]  }
 0xf0f   : > { %v4747_v30 = vld [vmem:[%s4981_s22 + $0x380] sm:$0xff]   ;;  %v4748_v54 = vld [vmem:[%s4981_s22 + $0x348] sm:$0xff]   ;;  %v4752_v35 = vld [vmem:[%s4981_s22 + $0x350] sm:$0xff]  }
 0xf10   : > { %4364 = vmatpush3.bf16.msra.mxu0 %v4706_v47  ;;  %4386 = vmatpush3.bf16.msra.mxu1 %v4707_v48  ;;  %v4749_v33 = vld [vmem:[%s4981_s22 + $0x3c8] sm:$0xff]   ;;  %v4755_v36 = vld [vmem:[%s4981_s22 + $0x390] sm:$0xff]   ;;  %v4756_v37 = vld [vmem:[%s4981_s22 + $0x358] sm:$0xff]  }
 0xf11   : > { %4365 = vmatprep.subr.bf16.mxu0 %v4708_v49  ;;  %4387 = vmatprep.subr.bf16.mxu1 %v4709_v50  ;;  %v4750_v34 = vld [vmem:[%s4981_s22 + $0x308] sm:$0xff]   ;;  %v4757_v13 = vld [vmem:[%s4981_s22 + $0x3d8] sm:$0xff]   ;;  %v4760_v39 = vld [vmem:[%s4981_s22 + $0x360] sm:$0xff]  }
 0xf12   : > { %v4751_v27 = vld [vmem:[%s4981_s22 + $0x388] sm:$0xff]   ;;  %v4758_v38 = vld [vmem:[%s4981_s22 + $0x318] sm:$0xff]   ;;  %v4761_v40 = vld [vmem:[%s4981_s22 + $0x3e0] sm:$0xff]  }
 0xf13   : > { %v4759_v4 = vld [vmem:[%s4981_s22 + $0x398] sm:$0xff]   ;;  %v4762_v41 = vld [vmem:[%s4981_s22 + $0x320] sm:$0xff]   ;;  %v4766_v47 = vld [vmem:[%s4981_s22 + $0x328] sm:$0xff]  }
 0xf14   : > { %4366 = vmatpush3.bf16.msra.mxu0 %v4710_v9  ;;  %4388 = vmatpush3.bf16.msra.mxu1 %v4711_v5  ;;  %v4763_v42 = vld [vmem:[%s4981_s22 + $0x3a0] sm:$0xff]   ;;  %v4767_v48 = vld [vmem:[%s4981_s22 + $0x3a8] sm:$0xff]   ;;  %v4768_v49 = vld [vmem:[%s4981_s22 + $0x370] sm:$0xff]  }
 0xf15   : > { %4395 = vmatprep.subr.bf16.mxu0 %v4712_v53  ;;  %4417 = vmatprep.subr.bf16.mxu1 %v4713_v55  ;;  %v4769_v50 = vld [vmem:[%s4981_s22 + $0x3f0] sm:$0xff]   ;;  %v4772_v53 = vld [vmem:[%s4981_s22 + $0x378] sm:$0xff]  }
 0xf16   : > { %v4770_v9 = vld [vmem:[%s4981_s22 + $0x330] sm:$0xff]   ;;  %v4773_v55 = vld [vmem:[%s4981_s22 + $0x3f8] sm:$0xff]  }
 0xf17   : > { %3645 = vmatmul.mubr.bf16.vlgmr.msra.gmra.mrb[56].mxu0 %v5341_v31  ;;  %3686 = vmatmul.mubr.bf16.vlgmr.msra.gmra.mrb[56].mxu1 %v5343_v32  ;;  %v4721_v31 = vld [vmem:[%s4981_s22 + $0x2d0] sm:$0xff]  }
 0xf18   : > { %4396 = vmatpush3.bf16.msra.mxu0 %v4714_v56  ;;  %3726 = vmatprep.mubr.bf16.mxu0 %v5366_v3  ;;  %v4722_v32 = vld [vmem:[%s4981_s22 + $0x210] sm:$0xff]   ;;  %v4728_v3 = vld [vmem:[%s4981_s22 + $0x260] sm:$0xff]   ;;  %v4774_v56 = vld [vmem:[%s4981_s22 + $0x338] sm:$0xff]  }
 0xf19   : > { %4418 = vmatpush3.bf16.msra.mxu1 %v4715_v57  ;;  %3767 = vmatprep.mubr.bf16.mxu1 %v5368_v17  ;;  %v4729_v17 = vld [vmem:[%s4981_s22 + $0x2e0] sm:$0xff]   ;;  %v4771_v5 = vld [vmem:[%s4981_s22 + $0x3b0] sm:$0xff]   ;;  %v4775_v57 = vld [vmem:[%s4981_s22 + $0x3b8] sm:$0xff]  }
 0xf1a   : > { %4397 = vmatprep.subr.bf16.mxu0 %v4716_v60  ;;  %4419 = vmatprep.subr.bf16.mxu1 %v4717_v61 }
 0xf1c   : > { %4398 = vmatpush3.bf16.msra.mxu0 %v4718_v62  ;;  %v4130_v62 = vld [vmem:[%s648_s2] ss:$0 sm:$0xff] }
 0xf1d   : > { %4420 = vmatpush3.bf16.msra.mxu1 %v4719_v63  ;;  %4399 = vmatprep.subr.bf16.mxu0 %v4720_v12 }
 0xf1e   : > { %4421 = vmatprep.subr.bf16.mxu1 %v4721_v31 }
 0xf20   : > { %4400 = vmatpush3.bf16.msra.mxu0 %v4722_v32 }
 0xf21   : > { %4422 = vmatpush3.bf16.msra.mxu1 %v4723_v16  ;;  %4401 = vmatprep.subr.bf16.mxu0 %v4724_v0 }
 0xf22   : > { %4423 = vmatprep.subr.bf16.mxu1 %v4725_v2 }
 0xf24   : > { %4402 = vmatpush3.bf16.msra.mxu0 %v4726_v8 }
 0xf25   : > { %4424 = vmatpush3.bf16.msra.mxu1 %v4727_v58  ;;  %4403 = vmatprep.subr.bf16.mxu0 %v4728_v3 }
 0xf26   : > { %4425 = vmatprep.subr.bf16.mxu1 %v4729_v17 }
 0xf28   : > { %4404 = vmatpush3.bf16.msra.mxu0 %v4730_v10 }
 0xf29   : > { %4426 = vmatpush3.bf16.msra.mxu1 %v4731_v11  ;;  %4405 = vmatprep.subr.bf16.mxu0 %v4732_v6 }
 0xf2a   : > { %4427 = vmatprep.subr.bf16.mxu1 %v4733_v14 }
 0xf2c   : > { %4406 = vmatpush3.bf16.msra.mxu0 %v4734_v15 }
 0xf2d   : > { %4428 = vmatpush3.bf16.msra.mxu1 %v4735_v18  ;;  %4407 = vmatprep.subr.bf16.mxu0 %v4736_v19 }
 0xf2e   : > { %4429 = vmatprep.subr.bf16.mxu1 %v4737_v7 }
 0xf30   : > { %4408 = vmatpush3.bf16.msra.mxu0 %v4738_v26 }
 0xf31   : > { %4430 = vmatpush3.bf16.msra.mxu1 %v4739_v20  ;;  %4409 = vmatprep.subr.bf16.mxu0 %v4740_v21 }
 0xf32   : > { %4431 = vmatprep.subr.bf16.mxu1 %v4741_v22 }
 0xf34   : > { %4410 = vmatpush3.bf16.msra.mxu0 %v4742_v24 }
 0xf35   : > { %4432 = vmatpush3.bf16.msra.mxu1 %v4743_v23  ;;  %4439 = vmatprep.subr.bf16.mxu0 %v4744_v25 }
 0xf36   : > { %4461 = vmatprep.subr.bf16.mxu1 %v4745_v28 }
 0xf37   : > { %3727 = vmatmul.mubr.bf16.vlgmr.msra.gmra.mrb[60].mxu0 %v5362_v59  ;;  %v4753_v59 = vld [vmem:[%s4981_s22 + $0x3d0] sm:$0xff]  }
 0xf38   : > { %3768 = vmatmul.mubr.bf16.vlgmr.msra.gmra.mrb[60].mxu1 %v5364_v1  ;;  %4440 = vmatpush3.bf16.msra.mxu0 %v4746_v29  ;;  %v4754_v1 = vld [vmem:[%s4981_s22 + $0x310] sm:$0xff]  }
 0xf39   : > { %3808 = vmatprep.mubr.bf16.mxu0 %v5384_v45  ;;  %4462 = vmatpush3.bf16.msra.mxu1 %v4747_v30  ;;  %v4764_v45 = vld [vmem:[%s4981_s22 + $0x368] sm:$0xff]  }
 0xf3a   : > { %3849 = vmatprep.mubr.bf16.mxu1 %v5386_v46  ;;  %4441 = vmatprep.subr.bf16.mxu0 %v4748_v54  ;;  %v4765_v46 = vld [vmem:[%s4981_s22 + $0x3e8] sm:$0xff]  }
 0xf3b   : > { %4463 = vmatprep.subr.bf16.mxu1 %v4749_v33 }
 0xf3c   : > { %4442 = vmatpush3.bf16.msra.mxu0 %v4750_v34 }
 0xf3d   : > { %4464 = vmatpush3.bf16.msra.mxu1 %v4751_v27  ;;  %4443 = vmatprep.subr.bf16.mxu0 %v4752_v35 }
 0xf3e   : > { %4465 = vmatprep.subr.bf16.mxu1 %v4753_v59 }
 0xf40   : > { %4444 = vmatpush3.bf16.msra.mxu0 %v4754_v1 }
 0xf41   : > { %4466 = vmatpush3.bf16.msra.mxu1 %v4755_v36  ;;  %4445 = vmatprep.subr.bf16.mxu0 %v4756_v37 }
 0xf42   : > { %4467 = vmatprep.subr.bf16.mxu1 %v4757_v13 }
 0xf44   : > { %4446 = vmatpush3.bf16.msra.mxu0 %v4758_v38 }
 0xf45   : > { %4468 = vmatpush3.bf16.msra.mxu1 %v4759_v4  ;;  %4447 = vmatprep.subr.bf16.mxu0 %v4760_v39 }
 0xf46   : > { %4469 = vmatprep.subr.bf16.mxu1 %v4761_v40 }
 0xf48   : > { %4448 = vmatpush3.bf16.msra.mxu0 %v4762_v41 }
 0xf49   : > { %4470 = vmatpush3.bf16.msra.mxu1 %v4763_v42  ;;  %4449 = vmatprep.subr.bf16.mxu0 %v4764_v45 }
 0xf4a   : > { %4471 = vmatprep.subr.bf16.mxu1 %v4765_v46 }
 0xf4c   : > { %4450 = vmatpush3.bf16.msra.mxu0 %v4766_v47 }
 0xf4d   : > { %4472 = vmatpush3.bf16.msra.mxu1 %v4767_v48  ;;  %4451 = vmatprep.subr.bf16.mxu0 %v4768_v49 }
 0xf4e   : > { %4473 = vmatprep.subr.bf16.mxu1 %v4769_v50 }
 0xf50   : > { %4452 = vmatpush3.bf16.msra.mxu0 %v4770_v9 }
 0xf51   : > { %4474 = vmatpush3.bf16.msra.mxu1 %v4771_v5  ;;  %4453 = vmatprep.subr.bf16.mxu0 %v4772_v53 }
 0xf52   : > { %4475 = vmatprep.subr.bf16.mxu1 %v4773_v55 }
 0xf54   : > { %4454 = vmatpush3.bf16.msra.mxu0 %v4774_v56 }
 0xf55   : > { %4476 = vmatpush3.bf16.msra.mxu1 %v4775_v57 }
 0xf57   : > { %3809 = vmatmul.mubr.bf16.vlgmr.msra.gmra.mrb[64].mxu0 %v5380_v43 }
 0xf58   : > { %3850 = vmatmul.mubr.bf16.vlgmr.msra.gmra.mrb[64].mxu1 %v5382_v44 }
 0xfca   : > { %v4323_v60 = vpop.f32.mrb[52].mxu0  ;;  %v4345_v61 = vpop.f32.mrb[52].mxu1 }
 0xfcb   : > { %v4324_v63 = vpop.f32.mrb[53].mxu0  ;;  %v4346_v12 = vpop.f32.mrb[53].mxu1 }
 0xfcc   : > { %v4325_v31 = vadd.f32 %v4324_v63, %v4323_v60  ;;  %v4347_v32 = vadd.f32 %v4346_v12, %v4345_v61  ;;  %v4326_v16 = vpop.f32.mrb[54].mxu0  ;;  %v4348_v0 = vpop.f32.mrb[54].mxu1 }
 0xfcd   : > { %v4327_v2 = vpop.f32.mrb[55].mxu0  ;;  %v4349_v8 = vpop.f32.mrb[55].mxu1 }
 0xfce   : > { %v3565_v58 = vadd.f32 %v4325_v31, %v4130_v62  ;;  %v4328_v3 = vadd.f32 %v4327_v2, %v4326_v16  ;;  %v4350_v43 = vadd.f32 %v4349_v8, %v4348_v0 }
 0xfd0   : > { %v3606_v17 = vadd.f32 %v4347_v32, %v3565_v58  ;;  %v3568_v44 = vadd.f32 %v4328_v3, %v4130_v62 }
 0xfd2   : > { %v3609_v10 = vadd.f32 %v4350_v43, %v3568_v44 }
 0xfea   : > { %v4367_v11 = vpop.f32.mrb[56].mxu0  ;;  %v4389_v6 = vpop.f32.mrb[56].mxu1 }
 0xfeb   : > { %v4368_v14 = vpop.f32.mrb[57].mxu0  ;;  %v4390_v15 = vpop.f32.mrb[57].mxu1 }
 0xfec   : > { %v4369_v18 = vadd.f32 %v4368_v14, %v4367_v11  ;;  %v4391_v19 = vadd.f32 %v4390_v15, %v4389_v6  ;;  %v4370_v7 = vpop.f32.mrb[58].mxu0  ;;  %v4392_v26 = vpop.f32.mrb[58].mxu1 }
 0xfed   : > { %v4371_v20 = vpop.f32.mrb[59].mxu0  ;;  %v4393_v21 = vpop.f32.mrb[59].mxu1 }
 0xfee   : > { %v3647_v22 = vadd.f32 %v4369_v18, %v3606_v17  ;;  %v4372_v24 = vadd.f32 %v4371_v20, %v4370_v7  ;;  %v4394_v23 = vadd.f32 %v4393_v21, %v4392_v26  ;;  %v4259_v26 = vld [vmem:[%s651_s3] ss:$0 sm:$0xff] }
 0xff0   : > { %v3688_v25 = vadd.f32 %v4391_v19, %v3647_v22  ;;  %v3650_v28 = vadd.f32 %v4372_v24, %v3609_v10  ;;  %v4260_v22 = vld [vmem:[%s654_s28] ss:$0 sm:$0xff] }
 0xff2   : > { %v3691_v29 = vadd.f32 %v4394_v23, %v3650_v28 }
0x100a   : > { %v4411_v30 = vpop.f32.mrb[60].mxu0 }
0x100b   : > { %v4433_v54 = vpop.f32.mrb[60].mxu1  ;;  %v4412_v33 = vpop.f32.mrb[61].mxu0 }
0x100c   : > { %v4413_v34 = vadd.f32 %v4412_v33, %v4411_v30  ;;  %v4434_v27 = vpop.f32.mrb[61].mxu1  ;;  %v4414_v35 = vpop.f32.mrb[62].mxu0 }
0x100d   : > { %v4435_v59 = vadd.f32 %v4434_v27, %v4433_v54  ;;  %v4436_v1 = vpop.f32.mrb[62].mxu1  ;;  %v4415_v36 = vpop.f32.mrb[63].mxu0 }
0x100e   : > { %v3729_v37 = vadd.f32 %v4413_v34, %v3688_v25  ;;  %v4416_v13 = vadd.f32 %v4415_v36, %v4414_v35  ;;  %v4437_v38 = vpop.f32.mrb[63].mxu1 }
0x100f   : > { %v4438_v4 = vadd.f32 %v4437_v38, %v4436_v1 }
0x1010   : > { %v3770_v39 = vadd.f32 %v4435_v59, %v3729_v37  ;;  %v3732_v40 = vadd.f32 %v4416_v13, %v3691_v29 }
0x1012   : > { %v3773_v41 = vadd.f32 %v4438_v4, %v3732_v40 }
0x102a   : > { %v4455_v42 = vpop.f32.mrb[64].mxu0 }
0x102b   : > { %v4477_v45 = vpop.f32.mrb[64].mxu1  ;;  %v4456_v46 = vpop.f32.mrb[65].mxu0 }
0x102c   : > { %v4457_v47 = vadd.f32 %v4456_v46, %v4455_v42  ;;  %v4478_v48 = vpop.f32.mrb[65].mxu1  ;;  %v4458_v49 = vpop.f32.mrb[66].mxu0 }
0x102d   : > { %v4479_v50 = vadd.f32 %v4478_v48, %v4477_v45  ;;  %v4480_v9 = vpop.f32.mrb[66].mxu1  ;;  %v4459_v5 = vpop.f32.mrb[67].mxu0 }
0x102e   : > { %v3811_v53 = vadd.f32 %v4457_v47, %v3770_v39  ;;  %v4460_v55 = vadd.f32 %v4459_v5, %v4458_v49  ;;  %v4481_v56 = vpop.f32.mrb[67].mxu1 }
0x102f   : > { %v4482_v57 = vadd.f32 %v4481_v56, %v4480_v9 }
0x1030   : > { %v3852_v60 = vadd.f32 %v4479_v50, %v3811_v53  ;;  %v3814_v61 = vadd.f32 %v4460_v55, %v3773_v41 }
0x1032   : > { %v3855_v62 = vadd.f32 %v4482_v57, %v3814_v61  ;;  %v3858_v63 = vadd.f32 %v3852_v60, %v5218_v51 }
0x1034   : > { %v3862_v12 = vsel %vm752_vm4, %v3858_v63, 0.0  ;;  %v3859_v31 = vadd.f32 %v3855_v62, %v5220_v52 }
0x1035   : > { %3863 = vadd.xlane.f32.xlu0 %v3862_v12 }
0x1036   : > { %v3865_v32 = vsel %vm752_vm4, %v3859_v31, 0.0 }
0x1037   : > { %3866 = vadd.xlane.f32.xlu1 %v3865_v32 }
0x10c2   : > { %v3864_v16 = vpop.xlane.xlu0 %3863 }
0x10c3   : > { %v3868_v0 = vmul.f32 0.03125, %v3864_v16 }
0x10c4   : > { %v3867_v2 = vpop.xlane.xlu1 %3866 }
0x10c5   : > { %v3870_v8 = vsub.f32 %v3858_v63, %v3868_v0  ;;  %v3869_v58 = vmul.f32 0.03125, %v3867_v2 }
0x10c7   : > { %v3871_v3 = vsub.f32 %v3859_v31, %v3869_v58  ;;  %v3872_v43 = vmul.f32 %v3870_v8, %v3870_v8 }
0x10c9   : > { %v3874_v17 = vsel %vm752_vm4, %v3872_v43, 0.0  ;;  %v3873_v44 = vmul.f32 %v3871_v3, %v3871_v3 }
0x10ca   : > { %3875 = vadd.xlane.f32.xlu0 %v3874_v17 }
0x10cb   : > { %v3877_v51 = vsel %vm752_vm4, %v3873_v44, 0.0 }
0x10cc   : > { %3878 = vadd.xlane.f32.xlu1 %v3877_v51 }
0x1157   : > { %v3876_v52 = vpop.xlane.xlu0 %3875 }
0x1158   : > { %v3880_v10 = vmul.f32 0.03125, %v3876_v52 }
0x1159   : > { %v3879_v11 = vpop.xlane.xlu1 %3878 }
0x115a   : > { %v3882_v6 = vmax.f32 %v3880_v10, 0.0  ;;  %v3881_v14 = vmul.f32 0.03125, %v3879_v11 }
0x115c   : > { %v3884_v15 = vadd.f32 1e-05, %v3882_v6  ;;  %v3883_v18 = vmax.f32 %v3881_v14, 0.0 }
0x115e   : > { %4812 = vrsqrt.f32 %v3884_v15  ;;  %v3885_v19 = vadd.f32 1e-05, %v3883_v18 }
0x1160   : > { %4814 = vrsqrt.f32 %v3885_v19 }
0x1168   : > { %v4813_v7 = vpop.eup %4812 }
0x1169   : > { %v3888_v20 = vmul.f32 %v4813_v7, %v3870_v8 }
0x116a   : > { %v4815_v21 = vpop.eup %4814 }
0x116b   : > { %v3896_v24 = vmul.f32 %v4259_v26, %v3888_v20  ;;  %v3889_v23 = vmul.f32 %v4815_v21, %v3871_v3 }
0x116d   : > { %v3904_v25 = vadd.f32 %v4260_v22, %v3896_v24  ;;  %v3897_v28 = vmul.f32 %v4259_v26, %v3889_v23 }
0x116f   : > { %3906 = vst.msk [vmem:[%s5533_s15] sm:$0xff] %vm752_vm4, %v3904_v25  ;;  %v3905_v29 = vadd.f32 %v4260_v22, %v3897_v28 }
0x1171   : > { %3907 = vst.msk [vmem:[%s5533_s15 + $0x8] sm:$0xff] %vm752_vm4, %v3905_v29 }
0x1172 PF: > { %s5539_s23 = sld [smem:[#allocation2_spill]] }
0x1178   : > { %s25_s18 = sadd.s32 1, %s5539_s23  }
0x1179   : > { %p22_p5 = scmp.ge.s32.totalorder %s25_s18, 4  }
0x117b   :  { %24 = sbr.rel (!%p22_p5) target bundleno = 7 (0x7), region = 143 }

</bundles_post_ra>
